<compile_context>
chip_gen: v5e
topology: v5e:2x2
jax: 0.10.0
libtpu: 0.0.40
codegen_flags: <defaults>
</compile_context>

<pallas_src>
import functools

import jax
import jax.numpy as jnp
import numpy as np
from jax import lax
from jax.experimental import pallas as pl
from jax.experimental.pallas import tpu as pltpu


def _round_up(v, m):
    return (v + m - 1) // m * m


def _conv_q_maps(xq_ref, w_ref, *, wq, n_rows):
    """3x3 conv (no bias) for each of the 4 max-pool offsets.

    xq_ref: (4, 1, Lpad, Cin) bf16  -- quarter maps of one sample, flattened
            over (hq, wq); Lpad >= Hq*Wq + 1 (zero padded).
    w_ref : (9, Cin, Cpad)    bf16  -- tap (kh, kw) -> slab kh*3+kw.

    Returns 4 f32 arrays of shape (n_rows, Cpad), n_rows = Hp*Wq.
    Rows with (row % Wq) == Wq-1 wrap across quarter-map rows and are garbage;
    callers mask / slice them.
    """
    w_taps = [w_ref[t] for t in range(9)]          # (Cin, Cpad) each, loaded once
    accs = []
    for dy in range(2):
        for dx in range(2):
            acc = None
            for kh in range(3):
                for kw in range(3):
                    r = dy + kh                    # row shift in original pixels
                    s = dx + kw                    # col shift in original pixels
                    qm = 2 * (r & 1) + (s & 1)     # which quarter map
                    start = (r >> 1) * wq + (s >> 1)
                    lhs = xq_ref[qm, 0, pl.ds(start, n_rows), :]    # (n_rows, Cin)
                    y = jnp.dot(lhs, w_taps[kh * 3 + kw],
                                preferred_element_type=jnp.float32)
                    acc = y if acc is None else acc + y
            accs.append(acc)
    return accs


def _stats_kernel(xq_ref, w_ref, mask_ref, out_ref, *, hp, wq):
    """Per-sample partial BN statistics: out[0] = sum(y), out[1] = sum(y*y)."""
    n_rows = hp * wq
    accs = _conv_q_maps(xq_ref, w_ref, wq=wq, n_rows=n_rows)
    maskf = mask_ref[...]                                   # (n_rows, 1) f32
    cpad = out_ref.shape[-1]
    s = jnp.zeros((1, cpad), jnp.float32)
    ss = jnp.zeros((1, cpad), jnp.float32)
    for acc in accs:
        am = acc * maskf                                    # zero the wrap column
        s = s + jnp.sum(am, axis=0, keepdims=True)
        ss = ss + jnp.sum(am * acc, axis=0, keepdims=True)  # masked acc^2
    out_ref[0, 0:1, :] = s
    out_ref[0, 1:2, :] = ss


def _apply_kernel(xq_ref, w_ref, scale_ref, shift_ref, out_ref, *, hp, wq):
    """Recompute conv, apply BN affine + ReLU, 2x2 max-pool, write pooled map."""
    n_rows = hp * wq
    accs = _conv_q_maps(xq_ref, w_ref, wq=wq, n_rows=n_rows)
    scale = scale_ref[...]                                  # (1, Cpad) f32
    shift = shift_ref[...]
    pooled = None
    for acc in accs:
        z = jnp.maximum(acc * scale + shift, 0.0)
        pooled = z if pooled is None else jnp.maximum(pooled, z)
    out_ref[0] = pooled.astype(out_ref.dtype)


def relation_conv_block(x, conv_w, conv_b, bn_gamma, bn_beta, *,
                        padding=0, eps=1e-5):
    """x: (B, Cin, H, W) NCHW f32.  conv_w: (Cout, Cin, 3, 3) OIHW.

    conv_b is accepted for API parity but unused: with batch-statistic BN the
    bias cancels exactly, so dropping it is free and changes nothing.
    """
    del conv_b
    B, Cin, H, W = x.shape
    Cout = conv_w.shape[0]
    Hi, Wi = H + 2 * padding, W + 2 * padding
    Ho, Wo = Hi - 2, Wi - 2
    assert Ho >= 2 and Wo >= 2
    # TODO(synk): odd conv-output sizes (floor max-pool drops last row/col) not handled.
    assert Ho % 2 == 0 and Wo % 2 == 0, "conv output spatial dims must be even"
    Hq, Wq = Hi // 2, Wi // 2
    Hp, Wp = Ho // 2, Wo // 2          # Hp = Hq - 1, Wp = Wq - 1
    Cpad = _round_up(max(Cout, 128), 128)
    Lq = Hq * Wq
    Lpad = _round_up(Lq + 1, 8)        # +1: the (rho=1, sigma=1) tap reads one row past Lq
    n_rows = Hp * Wq

    # ---- cheap layout glue (one relayout pass over x, in bf16) -------------
    xb = x.astype(jnp.bfloat16)
    if padding > 0:
        xb = jnp.pad(xb, ((0, 0), (0, 0), (padding, padding), (padding, padding)))
    xq = xb.reshape(B, Cin, Hq, 2, Wq, 2)               # (b, ci, hq, a, wq, c)
    xq = jnp.transpose(xq, (3, 5, 0, 2, 4, 1))          # (a, c, b, hq, wq, ci)
    xq = xq.reshape(4, B, Lq, Cin)
    xq = jnp.pad(xq, ((0, 0), (0, 0), (0, Lpad - Lq), (0, 0)))

    wt = jnp.transpose(conv_w, (2, 3, 1, 0)).reshape(9, Cin, Cout)
    wt = jnp.pad(wt, ((0, 0), (0, 0), (0, Cpad - Cout))).astype(jnp.bfloat16)

    gpad = jnp.pad(bn_gamma.astype(jnp.float32), (0, Cpad - Cout))
    bpad = jnp.pad(bn_beta.astype(jnp.float32), (0, Cpad - Cout))

    # Mask of valid pooled columns (zero on the wrap column j == Wq-1).
    col_mask = jnp.asarray(
        (np.arange(n_rows) % Wq < Wp).astype(np.float32).reshape(n_rows, 1))

    xq_spec = pl.BlockSpec((4, 1, Lpad, Cin), lambda b: (0, b, 0, 0))
    w_spec = pl.BlockSpec((9, Cin, Cpad), lambda b: (0, 0, 0))
    cparams = pltpu.CompilerParams(
        dimension_semantics=("parallel",),            # shards across v7x's 2 TCs
        vmem_limit_bytes=32 * 1024 * 1024)            # safe on v5e/v6e/v7x; blocks are small

    # ---- phase 1: per-sample partial (sum, sum_sq) over all conv pixels ----
    stats = pl.pallas_call(
        functools.partial(_stats_kernel, hp=Hp, wq=Wq),
        grid=(B,),
        in_specs=[xq_spec, w_spec,
                  pl.BlockSpec((n_rows, 1), lambda b: (0, 0))],
        out_specs=pl.BlockSpec((1, 2, Cpad), lambda b: (b, 0, 0)),
        out_shape=jax.ShapeDtypeStruct((B, 2, Cpad), jnp.float32),
        compiler_params=cparams,
    )(xq, wt, col_mask)

    total = jnp.sum(stats, axis=0)                    # (2, Cpad), tiny
    n = jnp.float32(B * 4 * Hp * Wp)                  # = B * Ho * Wo conv pixels
    mean = total[0] / n
    var = jnp.maximum(total[1] / n - mean * mean, 0.0)    # biased var (ddof=0)
    inv_std = lax.rsqrt(var + jnp.float32(eps))
    scale = (gpad * inv_std).reshape(1, Cpad)
    shift = (bpad - mean * gpad * inv_std).reshape(1, Cpad)

    # ---- phase 2: conv recompute + BN affine + ReLU + 2x2 max-pool ---------
    out_pad = pl.pallas_call(
        functools.partial(_apply_kernel, hp=Hp, wq=Wq),
        grid=(B,),
        in_specs=[xq_spec, w_spec,
                  pl.BlockSpec((1, Cpad), lambda b: (0, 0)),
                  pl.BlockSpec((1, Cpad), lambda b: (0, 0))],
        out_specs=pl.BlockSpec((1, n_rows, Cpad), lambda b: (b, 0, 0)),
        out_shape=jax.ShapeDtypeStruct((B, n_rows, Cpad), jnp.float32),
        compiler_params=cparams,
    )(xq, wt, scale, shift)

    # Drop the wrap column and the channel padding, return NCHW (module semantics).
    out = out_pad.reshape(B, Hp, Wq, Cpad)[:, :, :Wp, :Cout]
    return jnp.transpose(out, (0, 3, 1, 2))


def _reference(x, conv_w, conv_b, bn_gamma, bn_beta, *, padding=0, eps=1e-5):
    conv = lax.conv_general_dilated(
        x, conv_w, window_strides=(1, 1),
        padding=[(padding, padding), (padding, padding)],
        dimension_numbers=('NCHW', 'OIHW', 'NCHW'))
    conv = conv + conv_b[None, :, None, None]
    mean = conv.mean(axis=(0, 2, 3), keepdims=True)
    var = conv.var(axis=(0, 2, 3), keepdims=True)           # biased
    bn = ((conv - mean) * lax.rsqrt(var + eps)
          * bn_gamma[None, :, None, None] + bn_beta[None, :, None, None])
    r = jnp.maximum(bn, 0.0)
    B, C, Ho, Wo = r.shape
    Hp, Wp = Ho // 2, Wo // 2
    r = r[:, :, :2 * Hp, :2 * Wp].reshape(B, C, Hp, 2, Wp, 2)
    return r.max(axis=(3, 5))


if __name__ == "__main__":
    key = jax.random.PRNGKey(0)
    k1, k2, k3 = jax.random.split(key, 3)

    B, Cin, H, W = 2, 4, 16, 16
    Cout = 8

    # Conv2d weight/bias random; BN init mirrors backbone.init_layer (gamma=1, beta=0).
    x = jax.random.normal(k1, (B, Cin, H, W), jnp.float32)
    conv_w = jax.random.normal(k2, (Cout, Cin, 3, 3), jnp.float32) * 0.1
    conv_b = jax.random.normal(k3, (Cout,), jnp.float32) * 0.1
    bn_gamma = jnp.ones((Cout,), jnp.float32)
    bn_beta = jnp.zeros((Cout,), jnp.float32)

    for padding in (0, 1):
        out = relation_conv_block(x, conv_w, conv_b, bn_gamma, bn_beta,
                                  padding=padding)
        out = jax.block_until_ready(out)
        ref = _reference(x, conv_w, conv_b, bn_gamma, bn_beta, padding=padding)
        Hp = (H + 2 * padding - 2) // 2
        Wp = (W + 2 * padding - 2) // 2
        assert out.shape == (B, Cout, Hp, Wp), out.shape
        # bf16 MXU operands -> slightly looser tolerance than the pure-f32 version.
        np.testing.assert_allclose(np.asarray(out), np.asarray(ref),
                                   rtol=2e-2, atol=2e-2)
    print("KERNEL_OK")
</pallas_src>

<mosaic_0001>
module attributes {stable_mosaic.version = 11 : i64} {
  func.func @_stats_kernel(%arg0: i32, %arg1: memref<4x1x72x4xbf16, #tpu.memory_space<vmem>>, %arg2: memref<9x4x128xbf16, #tpu.memory_space<vmem>>, %arg3: memref<56x1xf32, #tpu.memory_space<vmem>>, %arg4: memref<1x2x128xf32, #tpu.memory_space<vmem>>) attributes {dimension_semantics = [#tpu.dimension_semantics<parallel>], iteration_bounds = array<i64: 2>, scalar_prefetch = 0 : i64, scratch_operands = 0 : i64, tpu.core_type = #tpu.core_type<tc>, window_params = [{transform_indices = @transform_0, window_bounds = array<i64: 4, 1, 72, 4>}, {pipeline_mode = #tpu.pipeline_mode<synchronous>, transform_indices = @transform_1, window_bounds = array<i64: 9, 4, 128>}, {pipeline_mode = #tpu.pipeline_mode<synchronous>, transform_indices = @transform_2, window_bounds = array<i64: 56, 1>}, {transform_indices = @transform_3, window_bounds = array<i64: 1, 2, 128>}]} {
    %c0 = arith.constant 0 : index
    %c0_0 = arith.constant 0 : index
    %c0_1 = arith.constant 0 : index
    %0 = vector.load %arg2[%c0, %c0_0, %c0_1] : memref<9x4x128xbf16, #tpu.memory_space<vmem>>, vector<1x4x128xbf16>
    %1 = vector.shape_cast %0 : vector<1x4x128xbf16> to vector<4x128xbf16>
    %c1 = arith.constant 1 : index
    %c0_2 = arith.constant 0 : index
    %c0_3 = arith.constant 0 : index
    %2 = vector.load %arg2[%c1, %c0_2, %c0_3] : memref<9x4x128xbf16, #tpu.memory_space<vmem>>, vector<1x4x128xbf16>
    %3 = vector.shape_cast %2 : vector<1x4x128xbf16> to vector<4x128xbf16>
    %c2 = arith.constant 2 : index
    %c0_4 = arith.constant 0 : index
    %c0_5 = arith.constant 0 : index
    %4 = vector.load %arg2[%c2, %c0_4, %c0_5] : memref<9x4x128xbf16, #tpu.memory_space<vmem>>, vector<1x4x128xbf16>
    %5 = vector.shape_cast %4 : vector<1x4x128xbf16> to vector<4x128xbf16>
    %c3 = arith.constant 3 : index
    %c0_6 = arith.constant 0 : index
    %c0_7 = arith.constant 0 : index
    %6 = vector.load %arg2[%c3, %c0_6, %c0_7] : memref<9x4x128xbf16, #tpu.memory_space<vmem>>, vector<1x4x128xbf16>
    %7 = vector.shape_cast %6 : vector<1x4x128xbf16> to vector<4x128xbf16>
    %c4 = arith.constant 4 : index
    %c0_8 = arith.constant 0 : index
    %c0_9 = arith.constant 0 : index
    %8 = vector.load %arg2[%c4, %c0_8, %c0_9] : memref<9x4x128xbf16, #tpu.memory_space<vmem>>, vector<1x4x128xbf16>
    %9 = vector.shape_cast %8 : vector<1x4x128xbf16> to vector<4x128xbf16>
    %c5 = arith.constant 5 : index
    %c0_10 = arith.constant 0 : index
    %c0_11 = arith.constant 0 : index
    %10 = vector.load %arg2[%c5, %c0_10, %c0_11] : memref<9x4x128xbf16, #tpu.memory_space<vmem>>, vector<1x4x128xbf16>
    %11 = vector.shape_cast %10 : vector<1x4x128xbf16> to vector<4x128xbf16>
    %c6 = arith.constant 6 : index
    %c0_12 = arith.constant 0 : index
    %c0_13 = arith.constant 0 : index
    %12 = vector.load %arg2[%c6, %c0_12, %c0_13] : memref<9x4x128xbf16, #tpu.memory_space<vmem>>, vector<1x4x128xbf16>
    %13 = vector.shape_cast %12 : vector<1x4x128xbf16> to vector<4x128xbf16>
    %c7 = arith.constant 7 : index
    %c0_14 = arith.constant 0 : index
    %c0_15 = arith.constant 0 : index
    %14 = vector.load %arg2[%c7, %c0_14, %c0_15] : memref<9x4x128xbf16, #tpu.memory_space<vmem>>, vector<1x4x128xbf16>
    %15 = vector.shape_cast %14 : vector<1x4x128xbf16> to vector<4x128xbf16>
    %c8 = arith.constant 8 : index
    %c0_16 = arith.constant 0 : index
    %c0_17 = arith.constant 0 : index
    %16 = vector.load %arg2[%c8, %c0_16, %c0_17] : memref<9x4x128xbf16, #tpu.memory_space<vmem>>, vector<1x4x128xbf16>
    %17 = vector.shape_cast %16 : vector<1x4x128xbf16> to vector<4x128xbf16>
    %c0_18 = arith.constant 0 : index
    %c0_19 = arith.constant 0 : index
    %c0_20 = arith.constant 0 : index
    %c0_21 = arith.constant 0 : index
    %18 = vector.load %arg1[%c0_18, %c0_19, %c0_20, %c0_21] : memref<4x1x72x4xbf16, #tpu.memory_space<vmem>>, vector<1x1x56x4xbf16>
    %19 = vector.shape_cast %18 : vector<1x1x56x4xbf16> to vector<56x4xbf16>
    %cst = arith.constant dense<0.000000e+00> : vector<56x128xf32>
    %20 = tpu.matmul %19, %1, %cst {dimension_numbers = #tpu.dot_dimension_numbers<[1], [0], [0], [1], [0, 0, 1, 1], [], []>} : vector<56x4xbf16>, vector<4x128xbf16>, vector<56x128xf32> -> vector<56x128xf32>
    %c1_22 = arith.constant 1 : index
    %c0_23 = arith.constant 0 : index
    %c0_24 = arith.constant 0 : index
    %c0_25 = arith.constant 0 : index
    %21 = vector.load %arg1[%c1_22, %c0_23, %c0_24, %c0_25] : memref<4x1x72x4xbf16, #tpu.memory_space<vmem>>, vector<1x1x56x4xbf16>
    %22 = vector.shape_cast %21 : vector<1x1x56x4xbf16> to vector<56x4xbf16>
    %cst_26 = arith.constant dense<0.000000e+00> : vector<56x128xf32>
    %23 = tpu.matmul %22, %3, %cst_26 {dimension_numbers = #tpu.dot_dimension_numbers<[1], [0], [0], [1], [0, 0, 1, 1], [], []>} : vector<56x4xbf16>, vector<4x128xbf16>, vector<56x128xf32> -> vector<56x128xf32>
    %24 = arith.addf %20, %23 : vector<56x128xf32>
    %c0_27 = arith.constant 0 : index
    %c0_28 = arith.constant 0 : index
    %c1_29 = arith.constant 1 : index
    %c0_30 = arith.constant 0 : index
    %25 = vector.load %arg1[%c0_27, %c0_28, %c1_29, %c0_30] : memref<4x1x72x4xbf16, #tpu.memory_space<vmem>>, vector<1x1x56x4xbf16>
    %26 = vector.shape_cast %25 : vector<1x1x56x4xbf16> to vector<56x4xbf16>
    %cst_31 = arith.constant dense<0.000000e+00> : vector<56x128xf32>
    %27 = tpu.matmul %26, %5, %cst_31 {dimension_numbers = #tpu.dot_dimension_numbers<[1], [0], [0], [1], [0, 0, 1, 1], [], []>} : vector<56x4xbf16>, vector<4x128xbf16>, vector<56x128xf32> -> vector<56x128xf32>
    %28 = arith.addf %24, %27 : vector<56x128xf32>
    %c2_32 = arith.constant 2 : index
    %c0_33 = arith.constant 0 : index
    %c0_34 = arith.constant 0 : index
    %c0_35 = arith.constant 0 : index
    %29 = vector.load %arg1[%c2_32, %c0_33, %c0_34, %c0_35] : memref<4x1x72x4xbf16, #tpu.memory_space<vmem>>, vector<1x1x56x4xbf16>
    %30 = vector.shape_cast %29 : vector<1x1x56x4xbf16> to vector<56x4xbf16>
    %cst_36 = arith.constant dense<0.000000e+00> : vector<56x128xf32>
    %31 = tpu.matmul %30, %7, %cst_36 {dimension_numbers = #tpu.dot_dimension_numbers<[1], [0], [0], [1], [0, 0, 1, 1], [], []>} : vector<56x4xbf16>, vector<4x128xbf16>, vector<56x128xf32> -> vector<56x128xf32>
    %32 = arith.addf %28, %31 : vector<56x128xf32>
    %c3_37 = arith.constant 3 : index
    %c0_38 = arith.constant 0 : index
    %c0_39 = arith.constant 0 : index
    %c0_40 = arith.constant 0 : index
    %33 = vector.load %arg1[%c3_37, %c0_38, %c0_39, %c0_40] : memref<4x1x72x4xbf16, #tpu.memory_space<vmem>>, vector<1x1x56x4xbf16>
    %34 = vector.shape_cast %33 : vector<1x1x56x4xbf16> to vector<56x4xbf16>
    %cst_41 = arith.constant dense<0.000000e+00> : vector<56x128xf32>
    %35 = tpu.matmul %34, %9, %cst_41 {dimension_numbers = #tpu.dot_dimension_numbers<[1], [0], [0], [1], [0, 0, 1, 1], [], []>} : vector<56x4xbf16>, vector<4x128xbf16>, vector<56x128xf32> -> vector<56x128xf32>
    %36 = arith.addf %32, %35 : vector<56x128xf32>
    %c2_42 = arith.constant 2 : index
    %c0_43 = arith.constant 0 : index
    %c1_44 = arith.constant 1 : index
    %c0_45 = arith.constant 0 : index
    %37 = vector.load %arg1[%c2_42, %c0_43, %c1_44, %c0_45] : memref<4x1x72x4xbf16, #tpu.memory_space<vmem>>, vector<1x1x56x4xbf16>
    %38 = vector.shape_cast %37 : vector<1x1x56x4xbf16> to vector<56x4xbf16>
    %cst_46 = arith.constant dense<0.000000e+00> : vector<56x128xf32>
    %39 = tpu.matmul %38, %11, %cst_46 {dimension_numbers = #tpu.dot_dimension_numbers<[1], [0], [0], [1], [0, 0, 1, 1], [], []>} : vector<56x4xbf16>, vector<4x128xbf16>, vector<56x128xf32> -> vector<56x128xf32>
    %40 = arith.addf %36, %39 : vector<56x128xf32>
    %c0_47 = arith.constant 0 : index
    %c0_48 = arith.constant 0 : index
    %c8_49 = arith.constant 8 : index
    %c0_50 = arith.constant 0 : index
    %41 = vector.load %arg1[%c0_47, %c0_48, %c8_49, %c0_50] : memref<4x1x72x4xbf16, #tpu.memory_space<vmem>>, vector<1x1x56x4xbf16>
    %42 = vector.shape_cast %41 : vector<1x1x56x4xbf16> to vector<56x4xbf16>
    %cst_51 = arith.constant dense<0.000000e+00> : vector<56x128xf32>
    %43 = tpu.matmul %42, %13, %cst_51 {dimension_numbers = #tpu.dot_dimension_numbers<[1], [0], [0], [1], [0, 0, 1, 1], [], []>} : vector<56x4xbf16>, vector<4x128xbf16>, vector<56x128xf32> -> vector<56x128xf32>
    %44 = arith.addf %40, %43 : vector<56x128xf32>
    %c1_52 = arith.constant 1 : index
    %c0_53 = arith.constant 0 : index
    %c8_54 = arith.constant 8 : index
    %c0_55 = arith.constant 0 : index
    %45 = vector.load %arg1[%c1_52, %c0_53, %c8_54, %c0_55] : memref<4x1x72x4xbf16, #tpu.memory_space<vmem>>, vector<1x1x56x4xbf16>
    %46 = vector.shape_cast %45 : vector<1x1x56x4xbf16> to vector<56x4xbf16>
    %cst_56 = arith.constant dense<0.000000e+00> : vector<56x128xf32>
    %47 = tpu.matmul %46, %15, %cst_56 {dimension_numbers = #tpu.dot_dimension_numbers<[1], [0], [0], [1], [0, 0, 1, 1], [], []>} : vector<56x4xbf16>, vector<4x128xbf16>, vector<56x128xf32> -> vector<56x128xf32>
    %48 = arith.addf %44, %47 : vector<56x128xf32>
    %c0_57 = arith.constant 0 : index
    %c0_58 = arith.constant 0 : index
    %c9 = arith.constant 9 : index
    %c0_59 = arith.constant 0 : index
    %49 = vector.load %arg1[%c0_57, %c0_58, %c9, %c0_59] : memref<4x1x72x4xbf16, #tpu.memory_space<vmem>>, vector<1x1x56x4xbf16>
    %50 = vector.shape_cast %49 : vector<1x1x56x4xbf16> to vector<56x4xbf16>
    %cst_60 = arith.constant dense<0.000000e+00> : vector<56x128xf32>
    %51 = tpu.matmul %50, %17, %cst_60 {dimension_numbers = #tpu.dot_dimension_numbers<[1], [0], [0], [1], [0, 0, 1, 1], [], []>} : vector<56x4xbf16>, vector<4x128xbf16>, vector<56x128xf32> -> vector<56x128xf32>
    %52 = arith.addf %48, %51 : vector<56x128xf32>
    %c1_61 = arith.constant 1 : index
    %c0_62 = arith.constant 0 : index
    %c0_63 = arith.constant 0 : index
    %c0_64 = arith.constant 0 : index
    %53 = vector.load %arg1[%c1_61, %c0_62, %c0_63, %c0_64] : memref<4x1x72x4xbf16, #tpu.memory_space<vmem>>, vector<1x1x56x4xbf16>
    %54 = vector.shape_cast %53 : vector<1x1x56x4xbf16> to vector<56x4xbf16>
    %cst_65 = arith.constant dense<0.000000e+00> : vector<56x128xf32>
    %55 = tpu.matmul %54, %1, %cst_65 {dimension_numbers = #tpu.dot_dimension_numbers<[1], [0], [0], [1], [0, 0, 1, 1], [], []>} : vector<56x4xbf16>, vector<4x128xbf16>, vector<56x128xf32> -> vector<56x128xf32>
    %c0_66 = arith.constant 0 : index
    %c0_67 = arith.constant 0 : index
    %c1_68 = arith.constant 1 : index
    %c0_69 = arith.constant 0 : index
    %56 = vector.load %arg1[%c0_66, %c0_67, %c1_68, %c0_69] : memref<4x1x72x4xbf16, #tpu.memory_space<vmem>>, vector<1x1x56x4xbf16>
    %57 = vector.shape_cast %56 : vector<1x1x56x4xbf16> to vector<56x4xbf16>
    %cst_70 = arith.constant dense<0.000000e+00> : vector<56x128xf32>
    %58 = tpu.matmul %57, %3, %cst_70 {dimension_numbers = #tpu.dot_dimension_numbers<[1], [0], [0], [1], [0, 0, 1, 1], [], []>} : vector<56x4xbf16>, vector<4x128xbf16>, vector<56x128xf32> -> vector<56x128xf32>
    %59 = arith.addf %55, %58 : vector<56x128xf32>
    %c1_71 = arith.constant 1 : index
    %c0_72 = arith.constant 0 : index
    %c1_73 = arith.constant 1 : index
    %c0_74 = arith.constant 0 : index
    %60 = vector.load %arg1[%c1_71, %c0_72, %c1_73, %c0_74] : memref<4x1x72x4xbf16, #tpu.memory_space<vmem>>, vector<1x1x56x4xbf16>
    %61 = vector.shape_cast %60 : vector<1x1x56x4xbf16> to vector<56x4xbf16>
    %cst_75 = arith.constant dense<0.000000e+00> : vector<56x128xf32>
    %62 = tpu.matmul %61, %5, %cst_75 {dimension_numbers = #tpu.dot_dimension_numbers<[1], [0], [0], [1], [0, 0, 1, 1], [], []>} : vector<56x4xbf16>, vector<4x128xbf16>, vector<56x128xf32> -> vector<56x128xf32>
    %63 = arith.addf %59, %62 : vector<56x128xf32>
    %c3_76 = arith.constant 3 : index
    %c0_77 = arith.constant 0 : index
    %c0_78 = arith.constant 0 : index
    %c0_79 = arith.constant 0 : index
    %64 = vector.load %arg1[%c3_76, %c0_77, %c0_78, %c0_79] : memref<4x1x72x4xbf16, #tpu.memory_space<vmem>>, vector<1x1x56x4xbf16>
    %65 = vector.shape_cast %64 : vector<1x1x56x4xbf16> to vector<56x4xbf16>
    %cst_80 = arith.constant dense<0.000000e+00> : vector<56x128xf32>
    %66 = tpu.matmul %65, %7, %cst_80 {dimension_numbers = #tpu.dot_dimension_numbers<[1], [0], [0], [1], [0, 0, 1, 1], [], []>} : vector<56x4xbf16>, vector<4x128xbf16>, vector<56x128xf32> -> vector<56x128xf32>
    %67 = arith.addf %63, %66 : vector<56x128xf32>
    %c2_81 = arith.constant 2 : index
    %c0_82 = arith.constant 0 : index
    %c1_83 = arith.constant 1 : index
    %c0_84 = arith.constant 0 : index
    %68 = vector.load %arg1[%c2_81, %c0_82, %c1_83, %c0_84] : memref<4x1x72x4xbf16, #tpu.memory_space<vmem>>, vector<1x1x56x4xbf16>
    %69 = vector.shape_cast %68 : vector<1x1x56x4xbf16> to vector<56x4xbf16>
    %cst_85 = arith.constant dense<0.000000e+00> : vector<56x128xf32>
    %70 = tpu.matmul %69, %9, %cst_85 {dimension_numbers = #tpu.dot_dimension_numbers<[1], [0], [0], [1], [0, 0, 1, 1], [], []>} : vector<56x4xbf16>, vector<4x128xbf16>, vector<56x128xf32> -> vector<56x128xf32>
    %71 = arith.addf %67, %70 : vector<56x128xf32>
    %c3_86 = arith.constant 3 : index
    %c0_87 = arith.constant 0 : index
    %c1_88 = arith.constant 1 : index
    %c0_89 = arith.constant 0 : index
    %72 = vector.load %arg1[%c3_86, %c0_87, %c1_88, %c0_89] : memref<4x1x72x4xbf16, #tpu.memory_space<vmem>>, vector<1x1x56x4xbf16>
    %73 = vector.shape_cast %72 : vector<1x1x56x4xbf16> to vector<56x4xbf16>
    %cst_90 = arith.constant dense<0.000000e+00> : vector<56x128xf32>
    %74 = tpu.matmul %73, %11, %cst_90 {dimension_numbers = #tpu.dot_dimension_numbers<[1], [0], [0], [1], [0, 0, 1, 1], [], []>} : vector<56x4xbf16>, vector<4x128xbf16>, vector<56x128xf32> -> vector<56x128xf32>
    %75 = arith.addf %71, %74 : vector<56x128xf32>
    %c1_91 = arith.constant 1 : index
    %c0_92 = arith.constant 0 : index
    %c8_93 = arith.constant 8 : index
    %c0_94 = arith.constant 0 : index
    %76 = vector.load %arg1[%c1_91, %c0_92, %c8_93, %c0_94] : memref<4x1x72x4xbf16, #tpu.memory_space<vmem>>, vector<1x1x56x4xbf16>
    %77 = vector.shape_cast %76 : vector<1x1x56x4xbf16> to vector<56x4xbf16>
    %cst_95 = arith.constant dense<0.000000e+00> : vector<56x128xf32>
    %78 = tpu.matmul %77, %13, %cst_95 {dimension_numbers = #tpu.dot_dimension_numbers<[1], [0], [0], [1], [0, 0, 1, 1], [], []>} : vector<56x4xbf16>, vector<4x128xbf16>, vector<56x128xf32> -> vector<56x128xf32>
    %79 = arith.addf %75, %78 : vector<56x128xf32>
    %c0_96 = arith.constant 0 : index
    %c0_97 = arith.constant 0 : index
    %c9_98 = arith.constant 9 : index
    %c0_99 = arith.constant 0 : index
    %80 = vector.load %arg1[%c0_96, %c0_97, %c9_98, %c0_99] : memref<4x1x72x4xbf16, #tpu.memory_space<vmem>>, vector<1x1x56x4xbf16>
    %81 = vector.shape_cast %80 : vector<1x1x56x4xbf16> to vector<56x4xbf16>
    %cst_100 = arith.constant dense<0.000000e+00> : vector<56x128xf32>
    %82 = tpu.matmul %81, %15, %cst_100 {dimension_numbers = #tpu.dot_dimension_numbers<[1], [0], [0], [1], [0, 0, 1, 1], [], []>} : vector<56x4xbf16>, vector<4x128xbf16>, vector<56x128xf32> -> vector<56x128xf32>
    %83 = arith.addf %79, %82 : vector<56x128xf32>
    %c1_101 = arith.constant 1 : index
    %c0_102 = arith.constant 0 : index
    %c9_103 = arith.constant 9 : index
    %c0_104 = arith.constant 0 : index
    %84 = vector.load %arg1[%c1_101, %c0_102, %c9_103, %c0_104] : memref<4x1x72x4xbf16, #tpu.memory_space<vmem>>, vector<1x1x56x4xbf16>
    %85 = vector.shape_cast %84 : vector<1x1x56x4xbf16> to vector<56x4xbf16>
    %cst_105 = arith.constant dense<0.000000e+00> : vector<56x128xf32>
    %86 = tpu.matmul %85, %17, %cst_105 {dimension_numbers = #tpu.dot_dimension_numbers<[1], [0], [0], [1], [0, 0, 1, 1], [], []>} : vector<56x4xbf16>, vector<4x128xbf16>, vector<56x128xf32> -> vector<56x128xf32>
    %87 = arith.addf %83, %86 : vector<56x128xf32>
    %c2_106 = arith.constant 2 : index
    %c0_107 = arith.constant 0 : index
    %c0_108 = arith.constant 0 : index
    %c0_109 = arith.constant 0 : index
    %88 = vector.load %arg1[%c2_106, %c0_107, %c0_108, %c0_109] : memref<4x1x72x4xbf16, #tpu.memory_space<vmem>>, vector<1x1x56x4xbf16>
    %89 = vector.shape_cast %88 : vector<1x1x56x4xbf16> to vector<56x4xbf16>
    %cst_110 = arith.constant dense<0.000000e+00> : vector<56x128xf32>
    %90 = tpu.matmul %89, %1, %cst_110 {dimension_numbers = #tpu.dot_dimension_numbers<[1], [0], [0], [1], [0, 0, 1, 1], [], []>} : vector<56x4xbf16>, vector<4x128xbf16>, vector<56x128xf32> -> vector<56x128xf32>
    %c3_111 = arith.constant 3 : index
    %c0_112 = arith.constant 0 : index
    %c0_113 = arith.constant 0 : index
    %c0_114 = arith.constant 0 : index
    %91 = vector.load %arg1[%c3_111, %c0_112, %c0_113, %c0_114] : memref<4x1x72x4xbf16, #tpu.memory_space<vmem>>, vector<1x1x56x4xbf16>
    %92 = vector.shape_cast %91 : vector<1x1x56x4xbf16> to vector<56x4xbf16>
    %cst_115 = arith.constant dense<0.000000e+00> : vector<56x128xf32>
    %93 = tpu.matmul %92, %3, %cst_115 {dimension_numbers = #tpu.dot_dimension_numbers<[1], [0], [0], [1], [0, 0, 1, 1], [], []>} : vector<56x4xbf16>, vector<4x128xbf16>, vector<56x128xf32> -> vector<56x128xf32>
    %94 = arith.addf %90, %93 : vector<56x128xf32>
    %c2_116 = arith.constant 2 : index
    %c0_117 = arith.constant 0 : index
    %c1_118 = arith.constant 1 : index
    %c0_119 = arith.constant 0 : index
    %95 = vector.load %arg1[%c2_116, %c0_117, %c1_118, %c0_119] : memref<4x1x72x4xbf16, #tpu.memory_space<vmem>>, vector<1x1x56x4xbf16>
    %96 = vector.shape_cast %95 : vector<1x1x56x4xbf16> to vector<56x4xbf16>
    %cst_120 = arith.constant dense<0.000000e+00> : vector<56x128xf32>
    %97 = tpu.matmul %96, %5, %cst_120 {dimension_numbers = #tpu.dot_dimension_numbers<[1], [0], [0], [1], [0, 0, 1, 1], [], []>} : vector<56x4xbf16>, vector<4x128xbf16>, vector<56x128xf32> -> vector<56x128xf32>
    %98 = arith.addf %94, %97 : vector<56x128xf32>
    %c0_121 = arith.constant 0 : index
    %c0_122 = arith.constant 0 : index
    %c8_123 = arith.constant 8 : index
    %c0_124 = arith.constant 0 : index
    %99 = vector.load %arg1[%c0_121, %c0_122, %c8_123, %c0_124] : memref<4x1x72x4xbf16, #tpu.memory_space<vmem>>, vector<1x1x56x4xbf16>
    %100 = vector.shape_cast %99 : vector<1x1x56x4xbf16> to vector<56x4xbf16>
    %cst_125 = arith.constant dense<0.000000e+00> : vector<56x128xf32>
    %101 = tpu.matmul %100, %7, %cst_125 {dimension_numbers = #tpu.dot_dimension_numbers<[1], [0], [0], [1], [0, 0, 1, 1], [], []>} : vector<56x4xbf16>, vector<4x128xbf16>, vector<56x128xf32> -> vector<56x128xf32>
    %102 = arith.addf %98, %101 : vector<56x128xf32>
    %c1_126 = arith.constant 1 : index
    %c0_127 = arith.constant 0 : index
    %c8_128 = arith.constant 8 : index
    %c0_129 = arith.constant 0 : index
    %103 = vector.load %arg1[%c1_126, %c0_127, %c8_128, %c0_129] : memref<4x1x72x4xbf16, #tpu.memory_space<vmem>>, vector<1x1x56x4xbf16>
    %104 = vector.shape_cast %103 : vector<1x1x56x4xbf16> to vector<56x4xbf16>
    %cst_130 = arith.constant dense<0.000000e+00> : vector<56x128xf32>
    %105 = tpu.matmul %104, %9, %cst_130 {dimension_numbers = #tpu.dot_dimension_numbers<[1], [0], [0], [1], [0, 0, 1, 1], [], []>} : vector<56x4xbf16>, vector<4x128xbf16>, vector<56x128xf32> -> vector<56x128xf32>
    %106 = arith.addf %102, %105 : vector<56x128xf32>
    %c0_131 = arith.constant 0 : index
    %c0_132 = arith.constant 0 : index
    %c9_133 = arith.constant 9 : index
    %c0_134 = arith.constant 0 : index
    %107 = vector.load %arg1[%c0_131, %c0_132, %c9_133, %c0_134] : memref<4x1x72x4xbf16, #tpu.memory_space<vmem>>, vector<1x1x56x4xbf16>
    %108 = vector.shape_cast %107 : vector<1x1x56x4xbf16> to vector<56x4xbf16>
    %cst_135 = arith.constant dense<0.000000e+00> : vector<56x128xf32>
    %109 = tpu.matmul %108, %11, %cst_135 {dimension_numbers = #tpu.dot_dimension_numbers<[1], [0], [0], [1], [0, 0, 1, 1], [], []>} : vector<56x4xbf16>, vector<4x128xbf16>, vector<56x128xf32> -> vector<56x128xf32>
    %110 = arith.addf %106, %109 : vector<56x128xf32>
    %c2_136 = arith.constant 2 : index
    %c0_137 = arith.constant 0 : index
    %c8_138 = arith.constant 8 : index
    %c0_139 = arith.constant 0 : index
    %111 = vector.load %arg1[%c2_136, %c0_137, %c8_138, %c0_139] : memref<4x1x72x4xbf16, #tpu.memory_space<vmem>>, vector<1x1x56x4xbf16>
    %112 = vector.shape_cast %111 : vector<1x1x56x4xbf16> to vector<56x4xbf16>
    %cst_140 = arith.constant dense<0.000000e+00> : vector<56x128xf32>
    %113 = tpu.matmul %112, %13, %cst_140 {dimension_numbers = #tpu.dot_dimension_numbers<[1], [0], [0], [1], [0, 0, 1, 1], [], []>} : vector<56x4xbf16>, vector<4x128xbf16>, vector<56x128xf32> -> vector<56x128xf32>
    %114 = arith.addf %110, %113 : vector<56x128xf32>
    %c3_141 = arith.constant 3 : index
    %c0_142 = arith.constant 0 : index
    %c8_143 = arith.constant 8 : index
    %c0_144 = arith.constant 0 : index
    %115 = vector.load %arg1[%c3_141, %c0_142, %c8_143, %c0_144] : memref<4x1x72x4xbf16, #tpu.memory_space<vmem>>, vector<1x1x56x4xbf16>
    %116 = vector.shape_cast %115 : vector<1x1x56x4xbf16> to vector<56x4xbf16>
    %cst_145 = arith.constant dense<0.000000e+00> : vector<56x128xf32>
    %117 = tpu.matmul %116, %15, %cst_145 {dimension_numbers = #tpu.dot_dimension_numbers<[1], [0], [0], [1], [0, 0, 1, 1], [], []>} : vector<56x4xbf16>, vector<4x128xbf16>, vector<56x128xf32> -> vector<56x128xf32>
    %118 = arith.addf %114, %117 : vector<56x128xf32>
    %c2_146 = arith.constant 2 : index
    %c0_147 = arith.constant 0 : index
    %c9_148 = arith.constant 9 : index
    %c0_149 = arith.constant 0 : index
    %119 = vector.load %arg1[%c2_146, %c0_147, %c9_148, %c0_149] : memref<4x1x72x4xbf16, #tpu.memory_space<vmem>>, vector<1x1x56x4xbf16>
    %120 = vector.shape_cast %119 : vector<1x1x56x4xbf16> to vector<56x4xbf16>
    %cst_150 = arith.constant dense<0.000000e+00> : vector<56x128xf32>
    %121 = tpu.matmul %120, %17, %cst_150 {dimension_numbers = #tpu.dot_dimension_numbers<[1], [0], [0], [1], [0, 0, 1, 1], [], []>} : vector<56x4xbf16>, vector<4x128xbf16>, vector<56x128xf32> -> vector<56x128xf32>
    %122 = arith.addf %118, %121 : vector<56x128xf32>
    %c3_151 = arith.constant 3 : index
    %c0_152 = arith.constant 0 : index
    %c0_153 = arith.constant 0 : index
    %c0_154 = arith.constant 0 : index
    %123 = vector.load %arg1[%c3_151, %c0_152, %c0_153, %c0_154] : memref<4x1x72x4xbf16, #tpu.memory_space<vmem>>, vector<1x1x56x4xbf16>
    %124 = vector.shape_cast %123 : vector<1x1x56x4xbf16> to vector<56x4xbf16>
    %cst_155 = arith.constant dense<0.000000e+00> : vector<56x128xf32>
    %125 = tpu.matmul %124, %1, %cst_155 {dimension_numbers = #tpu.dot_dimension_numbers<[1], [0], [0], [1], [0, 0, 1, 1], [], []>} : vector<56x4xbf16>, vector<4x128xbf16>, vector<56x128xf32> -> vector<56x128xf32>
    %c2_156 = arith.constant 2 : index
    %c0_157 = arith.constant 0 : index
    %c1_158 = arith.constant 1 : index
    %c0_159 = arith.constant 0 : index
    %126 = vector.load %arg1[%c2_156, %c0_157, %c1_158, %c0_159] : memref<4x1x72x4xbf16, #tpu.memory_space<vmem>>, vector<1x1x56x4xbf16>
    %127 = vector.shape_cast %126 : vector<1x1x56x4xbf16> to vector<56x4xbf16>
    %cst_160 = arith.constant dense<0.000000e+00> : vector<56x128xf32>
    %128 = tpu.matmul %127, %3, %cst_160 {dimension_numbers = #tpu.dot_dimension_numbers<[1], [0], [0], [1], [0, 0, 1, 1], [], []>} : vector<56x4xbf16>, vector<4x128xbf16>, vector<56x128xf32> -> vector<56x128xf32>
    %129 = arith.addf %125, %128 : vector<56x128xf32>
    %c3_161 = arith.constant 3 : index
    %c0_162 = arith.constant 0 : index
    %c1_163 = arith.constant 1 : index
    %c0_164 = arith.constant 0 : index
    %130 = vector.load %arg1[%c3_161, %c0_162, %c1_163, %c0_164] : memref<4x1x72x4xbf16, #tpu.memory_space<vmem>>, vector<1x1x56x4xbf16>
    %131 = vector.shape_cast %130 : vector<1x1x56x4xbf16> to vector<56x4xbf16>
    %cst_165 = arith.constant dense<0.000000e+00> : vector<56x128xf32>
    %132 = tpu.matmul %131, %5, %cst_165 {dimension_numbers = #tpu.dot_dimension_numbers<[1], [0], [0], [1], [0, 0, 1, 1], [], []>} : vector<56x4xbf16>, vector<4x128xbf16>, vector<56x128xf32> -> vector<56x128xf32>
    %133 = arith.addf %129, %132 : vector<56x128xf32>
    %c1_166 = arith.constant 1 : index
    %c0_167 = arith.constant 0 : index
    %c8_168 = arith.constant 8 : index
    %c0_169 = arith.constant 0 : index
    %134 = vector.load %arg1[%c1_166, %c0_167, %c8_168, %c0_169] : memref<4x1x72x4xbf16, #tpu.memory_space<vmem>>, vector<1x1x56x4xbf16>
    %135 = vector.shape_cast %134 : vector<1x1x56x4xbf16> to vector<56x4xbf16>
    %cst_170 = arith.constant dense<0.000000e+00> : vector<56x128xf32>
    %136 = tpu.matmul %135, %7, %cst_170 {dimension_numbers = #tpu.dot_dimension_numbers<[1], [0], [0], [1], [0, 0, 1, 1], [], []>} : vector<56x4xbf16>, vector<4x128xbf16>, vector<56x128xf32> -> vector<56x128xf32>
    %137 = arith.addf %133, %136 : vector<56x128xf32>
    %c0_171 = arith.constant 0 : index
    %c0_172 = arith.constant 0 : index
    %c9_173 = arith.constant 9 : index
    %c0_174 = arith.constant 0 : index
    %138 = vector.load %arg1[%c0_171, %c0_172, %c9_173, %c0_174] : memref<4x1x72x4xbf16, #tpu.memory_space<vmem>>, vector<1x1x56x4xbf16>
    %139 = vector.shape_cast %138 : vector<1x1x56x4xbf16> to vector<56x4xbf16>
    %cst_175 = arith.constant dense<0.000000e+00> : vector<56x128xf32>
    %140 = tpu.matmul %139, %9, %cst_175 {dimension_numbers = #tpu.dot_dimension_numbers<[1], [0], [0], [1], [0, 0, 1, 1], [], []>} : vector<56x4xbf16>, vector<4x128xbf16>, vector<56x128xf32> -> vector<56x128xf32>
    %141 = arith.addf %137, %140 : vector<56x128xf32>
    %c1_176 = arith.constant 1 : index
    %c0_177 = arith.constant 0 : index
    %c9_178 = arith.constant 9 : index
    %c0_179 = arith.constant 0 : index
    %142 = vector.load %arg1[%c1_176, %c0_177, %c9_178, %c0_179] : memref<4x1x72x4xbf16, #tpu.memory_space<vmem>>, vector<1x1x56x4xbf16>
    %143 = vector.shape_cast %142 : vector<1x1x56x4xbf16> to vector<56x4xbf16>
    %cst_180 = arith.constant dense<0.000000e+00> : vector<56x128xf32>
    %144 = tpu.matmul %143, %11, %cst_180 {dimension_numbers = #tpu.dot_dimension_numbers<[1], [0], [0], [1], [0, 0, 1, 1], [], []>} : vector<56x4xbf16>, vector<4x128xbf16>, vector<56x128xf32> -> vector<56x128xf32>
    %145 = arith.addf %141, %144 : vector<56x128xf32>
    %c3_181 = arith.constant 3 : index
    %c0_182 = arith.constant 0 : index
    %c8_183 = arith.constant 8 : index
    %c0_184 = arith.constant 0 : index
    %146 = vector.load %arg1[%c3_181, %c0_182, %c8_183, %c0_184] : memref<4x1x72x4xbf16, #tpu.memory_space<vmem>>, vector<1x1x56x4xbf16>
    %147 = vector.shape_cast %146 : vector<1x1x56x4xbf16> to vector<56x4xbf16>
    %cst_185 = arith.constant dense<0.000000e+00> : vector<56x128xf32>
    %148 = tpu.matmul %147, %13, %cst_185 {dimension_numbers = #tpu.dot_dimension_numbers<[1], [0], [0], [1], [0, 0, 1, 1], [], []>} : vector<56x4xbf16>, vector<4x128xbf16>, vector<56x128xf32> -> vector<56x128xf32>
    %149 = arith.addf %145, %148 : vector<56x128xf32>
    %c2_186 = arith.constant 2 : index
    %c0_187 = arith.constant 0 : index
    %c9_188 = arith.constant 9 : index
    %c0_189 = arith.constant 0 : index
    %150 = vector.load %arg1[%c2_186, %c0_187, %c9_188, %c0_189] : memref<4x1x72x4xbf16, #tpu.memory_space<vmem>>, vector<1x1x56x4xbf16>
    %151 = vector.shape_cast %150 : vector<1x1x56x4xbf16> to vector<56x4xbf16>
    %cst_190 = arith.constant dense<0.000000e+00> : vector<56x128xf32>
    %152 = tpu.matmul %151, %15, %cst_190 {dimension_numbers = #tpu.dot_dimension_numbers<[1], [0], [0], [1], [0, 0, 1, 1], [], []>} : vector<56x4xbf16>, vector<4x128xbf16>, vector<56x128xf32> -> vector<56x128xf32>
    %153 = arith.addf %149, %152 : vector<56x128xf32>
    %c3_191 = arith.constant 3 : index
    %c0_192 = arith.constant 0 : index
    %c9_193 = arith.constant 9 : index
    %c0_194 = arith.constant 0 : index
    %154 = vector.load %arg1[%c3_191, %c0_192, %c9_193, %c0_194] : memref<4x1x72x4xbf16, #tpu.memory_space<vmem>>, vector<1x1x56x4xbf16>
    %155 = vector.shape_cast %154 : vector<1x1x56x4xbf16> to vector<56x4xbf16>
    %cst_195 = arith.constant dense<0.000000e+00> : vector<56x128xf32>
    %156 = tpu.matmul %155, %17, %cst_195 {dimension_numbers = #tpu.dot_dimension_numbers<[1], [0], [0], [1], [0, 0, 1, 1], [], []>} : vector<56x4xbf16>, vector<4x128xbf16>, vector<56x128xf32> -> vector<56x128xf32>
    %157 = arith.addf %153, %156 : vector<56x128xf32>
    %c0_196 = arith.constant 0 : index
    %c0_197 = arith.constant 0 : index
    %158 = vector.load %arg3[%c0_196, %c0_197] : memref<56x1xf32, #tpu.memory_space<vmem>>, vector<56x1xf32>
    %cst_198 = arith.constant 0.000000e+00 : f32
    %159 = vector.broadcast %cst_198 : f32 to vector<1x128xf32>
    %cst_199 = arith.constant 0.000000e+00 : f32
    %160 = vector.broadcast %cst_199 : f32 to vector<1x128xf32>
    %161 = vector.broadcast %158 : vector<56x1xf32> to vector<56x128xf32>
    %162 = arith.mulf %52, %161 : vector<56x128xf32>
    %cst_200 = arith.constant dense<0.000000e+00> : vector<128xf32>
    %163 = vector.multi_reduction <add>, %162, %cst_200 [0] : vector<56x128xf32> to vector<128xf32>
    %164 = vector.shape_cast %163 : vector<128xf32> to vector<1x128xf32>
    %165 = arith.addf %159, %164 : vector<1x128xf32>
    %166 = arith.mulf %162, %52 : vector<56x128xf32>
    %cst_201 = arith.constant dense<0.000000e+00> : vector<128xf32>
    %167 = vector.multi_reduction <add>, %166, %cst_201 [0] : vector<56x128xf32> to vector<128xf32>
    %168 = vector.shape_cast %167 : vector<128xf32> to vector<1x128xf32>
    %169 = arith.addf %160, %168 : vector<1x128xf32>
    %170 = vector.broadcast %158 : vector<56x1xf32> to vector<56x128xf32>
    %171 = arith.mulf %87, %170 : vector<56x128xf32>
    %cst_202 = arith.constant dense<0.000000e+00> : vector<128xf32>
    %172 = vector.multi_reduction <add>, %171, %cst_202 [0] : vector<56x128xf32> to vector<128xf32>
    %173 = vector.shape_cast %172 : vector<128xf32> to vector<1x128xf32>
    %174 = arith.addf %165, %173 : vector<1x128xf32>
    %175 = arith.mulf %171, %87 : vector<56x128xf32>
    %cst_203 = arith.constant dense<0.000000e+00> : vector<128xf32>
    %176 = vector.multi_reduction <add>, %175, %cst_203 [0] : vector<56x128xf32> to vector<128xf32>
    %177 = vector.shape_cast %176 : vector<128xf32> to vector<1x128xf32>
    %178 = arith.addf %169, %177 : vector<1x128xf32>
    %179 = vector.broadcast %158 : vector<56x1xf32> to vector<56x128xf32>
    %180 = arith.mulf %122, %179 : vector<56x128xf32>
    %cst_204 = arith.constant dense<0.000000e+00> : vector<128xf32>
    %181 = vector.multi_reduction <add>, %180, %cst_204 [0] : vector<56x128xf32> to vector<128xf32>
    %182 = vector.shape_cast %181 : vector<128xf32> to vector<1x128xf32>
    %183 = arith.addf %174, %182 : vector<1x128xf32>
    %184 = arith.mulf %180, %122 : vector<56x128xf32>
    %cst_205 = arith.constant dense<0.000000e+00> : vector<128xf32>
    %185 = vector.multi_reduction <add>, %184, %cst_205 [0] : vector<56x128xf32> to vector<128xf32>
    %186 = vector.shape_cast %185 : vector<128xf32> to vector<1x128xf32>
    %187 = arith.addf %178, %186 : vector<1x128xf32>
    %188 = vector.broadcast %158 : vector<56x1xf32> to vector<56x128xf32>
    %189 = arith.mulf %157, %188 : vector<56x128xf32>
    %cst_206 = arith.constant dense<0.000000e+00> : vector<128xf32>
    %190 = vector.multi_reduction <add>, %189, %cst_206 [0] : vector<56x128xf32> to vector<128xf32>
    %191 = vector.shape_cast %190 : vector<128xf32> to vector<1x128xf32>
    %192 = arith.addf %183, %191 : vector<1x128xf32>
    %193 = arith.mulf %189, %157 : vector<56x128xf32>
    %cst_207 = arith.constant dense<0.000000e+00> : vector<128xf32>
    %194 = vector.multi_reduction <add>, %193, %cst_207 [0] : vector<56x128xf32> to vector<128xf32>
    %195 = vector.shape_cast %194 : vector<128xf32> to vector<1x128xf32>
    %196 = arith.addf %187, %195 : vector<1x128xf32>
    %c0_208 = arith.constant 0 : index
    %c0_209 = arith.constant 0 : index
    %c0_210 = arith.constant 0 : index
    %197 = vector.load %arg4[%c0_208, %c0_209, %c0_210] : memref<1x2x128xf32, #tpu.memory_space<vmem>>, vector<1x1x128xf32>
    %198 = vector.shape_cast %197 : vector<1x1x128xf32> to vector<1x128xf32>
    %199 = vector.shape_cast %192 : vector<1x128xf32> to vector<1x1x128xf32>
    tpu.vector_store %arg4[%c0_208, %c0_209, %c0_210], %199 {strides = array<i32>} : memref<1x2x128xf32, #tpu.memory_space<vmem>>, vector<1x1x128xf32>,
    %c0_211 = arith.constant 0 : index
    %c1_212 = arith.constant 1 : index
    %c0_213 = arith.constant 0 : index
    %200 = vector.load %arg4[%c0_211, %c1_212, %c0_213] : memref<1x2x128xf32, #tpu.memory_space<vmem>>, vector<1x1x128xf32>
    %201 = vector.shape_cast %200 : vector<1x1x128xf32> to vector<1x128xf32>
    %202 = vector.shape_cast %196 : vector<1x128xf32> to vector<1x1x128xf32>
    tpu.vector_store %arg4[%c0_211, %c1_212, %c0_213], %202 {strides = array<i32>} : memref<1x2x128xf32, #tpu.memory_space<vmem>>, vector<1x1x128xf32>,
    return
  }
  func.func @transform_0(%arg0: i32) -> (i32, i32, i32, i32) {
    %c0_i32 = arith.constant 0 : i32
    %c0_i32_0 = arith.constant 0 : i32
    %c0_i32_1 = arith.constant 0 : i32
    %c0_i32_2 = arith.constant 0 : i32
    return %c0_i32, %arg0, %c0_i32_0, %c0_i32_1 : i32, i32, i32, i32
  }
  func.func @transform_1(%arg0: i32) -> (i32, i32, i32) {
    %c0_i32 = arith.constant 0 : i32
    %c0_i32_0 = arith.constant 0 : i32
    %c0_i32_1 = arith.constant 0 : i32
    %c0_i32_2 = arith.constant 0 : i32
    return %c0_i32, %c0_i32_0, %c0_i32_1 : i32, i32, i32
  }
  func.func @transform_2(%arg0: i32) -> (i32, i32) {
    %c0_i32 = arith.constant 0 : i32
    %c0_i32_0 = arith.constant 0 : i32
    %c0_i32_1 = arith.constant 0 : i32
    return %c0_i32, %c0_i32_0 : i32, i32
  }
  func.func @transform_3(%arg0: i32) -> (i32, i32, i32) {
    %c0_i32 = arith.constant 0 : i32
    %c0_i32_0 = arith.constant 0 : i32
    %c0_i32_1 = arith.constant 0 : i32
    return %arg0, %c0_i32, %c0_i32_0 : i32, i32, i32
  }
}

</mosaic_0001>

<bundles_post_ra>
// kernel: tpu_custom_call.1
= control target key start
LH: loop header
LB: loop body
LE: loop exit
PB: predicated region body
PF: predicated region fallthrough
CT: control target
= control target key end

     0   :  { %8 = vsyncpa [#allocation4], 0  ;;  %s4282_s0 = inlined_call_operand.vmem [shape: bf16[4,2,72,4], index: 0, kind: input, shape index: {}]   ;;  %s4283_s1 = inlined_call_operand.vmem [shape: bf16[9,4,128], index: 1, kind: input, shape index: {}]   ;;  %s4284_s2 = inlined_call_operand.vmem [shape: f32[56,1], index: 2, kind: input, shape index: {}]   ;;  %s4285_s3 = inlined_call_operand.hbm [shape: f32[2,2,128], index: 3, kind: output, shape index: {}]  }
   0x1   :  { %10 = vsyncpa [#allocation4 + $0x1], 0  ;;  %s3336_s12 = smov 0   ;;  %s3338_s13 = smov 0  }
   0x2   :  { %s3340_s14 = smov 0   ;;  %s3342_s15 = smov 0  }
   0x3 LB: > { %s2684_s16 = sadd.s32 4294967295, %s3313_s15   ;;  %s2685_s17 = sadd.s32 4294967294, %s3313_s15   ;;  %s3313_s15 = sphi %s3342_s15, %s4311_s15   ;;  %s3309_s14 = sphi %s3340_s14, %s4310_s14   ;;  %s3305_s13 = sphi %s3338_s13, %s4309_s13   ;;  %s3301_s12 = sphi %s3336_s12, %s4308_s12  }
   0x4   : > { %s3359_s18 = sadd.s32 1, %s3313_s15   ;;  %s23_s19 = sadd.s32 1, %s3309_s14 }
   0x5   : > { %s20_s20 = ssub.s32 %s3313_s15, %s3359_s18  ;;  %p30_p0 = scmp.ne.s32.totalorder %s3309_s14, %s3305_s13 }
   0x6   : > { %p21_p1 = scmp.eq.s32.totalorder %s20_s20, 0  ;;  %p31_p2 = scmp.eq.s32.totalorder %s3313_s15, 0 }
   0x7   : > { %p102_p3 = scmp.eq.s32.totalorder %s2684_s16, 1  ;;  %p107_p4 = scmp.ne.s32.totalorder %s3305_s13, %s3301_s12 }
   0x8   : > { %s3372_s21 = scalar_select %p21_p1, %s3309_s14, %s23_s19  }
   0x9   : > { %p32_p5 = por %p31_p2, %p30_p0  ;;  %p3374_p6 = por %p102_p3, %p30_p0 }
   0xa   : > { %p108_p7 = scmp.eq.s32.totalorder %s2685_s17, 1  ;;  %p2687_p9 = scmp.ge.s32.totalorder %s3313_s15, 2 }
   0xc   : > { %p3378_p8 = por %p108_p7, %p107_p4  ;;  %130 = sbr.rel (%p2687_p9) target bundleno = 42 (0x2a), region = 24 }
  0x11   : > { %133 = sbr.rel (!%p32_p5) target bundleno = 42 (0x2a), region = 28  ;;  %s135_s24 = sand.u32 (%p32_p5), 1, %s3309_s14  }
  0x12   : > { %s3199_s25 = smul.u32 (%p32_p5), 36, %s3313_s15 }
  0x13   : > { %s3198_s26 = smul.u32 (%p32_p5), 144, %s135_s24 }
  0x14   : > { %s3390_s29 = scalar_lea.vmem (%p32_p5), %s4282_s0, %s3199_s25 }
  0x15   : > { %v157_v0 = vld [vmem:[%s3390_s29] sm:$0xff] (%p32_p5)   ;;  %v161_v1 = vld [vmem:[%s3390_s29 + $0x8] sm:$0xff] (%p32_p5)   ;;  %v165_v2 = vld [vmem:[%s3390_s29 + $0x10] sm:$0xff] (%p32_p5)   ;;  %s3395_s30 = scalar_lea.vmem (%p32_p5), [#allocation2], %s3198_s26 }
  0x16   : > { %158 = vst [vmem:[%s3395_s30] sm:$0xff] %v157_v0   ;;  %v169_v3 = vld [vmem:[%s3390_s29 + $0x18] sm:$0xff]   ;;  %v173_v4 = vld [vmem:[%s3390_s29 + $0x20] sm:$0xf]  ;;  %v175_v5 = vld [vmem:[%s3390_s29 + $0x48] sm:$0xff]  }
  0x17   : > { %162 = vst [vmem:[%s3395_s30 + $0x8] sm:$0xff] %v161_v1   ;;  %v179_v6 = vld [vmem:[%s3390_s29 + $0x50] sm:$0xff]   ;;  %v183_v7 = vld [vmem:[%s3390_s29 + $0x58] sm:$0xff]   ;;  %v187_v8 = vld [vmem:[%s3390_s29 + $0x60] sm:$0xff]  }
  0x18   : > { %166 = vst [vmem:[%s3395_s30 + $0x10] sm:$0xff] %v165_v2   ;;  %v191_v9 = vld [vmem:[%s3390_s29 + $0x68] sm:$0xf]  ;;  %v193_v10 = vld [vmem:[%s3390_s29 + $0x90] sm:$0xff]   ;;  %v197_v11 = vld [vmem:[%s3390_s29 + $0x98] sm:$0xff]  }
  0x19   : > { %170 = vst [vmem:[%s3395_s30 + $0x18] sm:$0xff] %v169_v3   ;;  %v201_v12 = vld [vmem:[%s3390_s29 + $0xa0] sm:$0xff]   ;;  %v205_v13 = vld [vmem:[%s3390_s29 + $0xa8] sm:$0xff]   ;;  %v209_v14 = vld [vmem:[%s3390_s29 + $0xb0] sm:$0xf] }
  0x1a   : > { %174 = vst [vmem:[%s3395_s30 + $0x20] sm:$0xf] %v173_v4  ;;  %v211_v15 = vld [vmem:[%s3390_s29 + $0xd8] sm:$0xff]   ;;  %v215_v16 = vld [vmem:[%s3390_s29 + $0xe0] sm:$0xff]   ;;  %v219_v17 = vld [vmem:[%s3390_s29 + $0xe8] sm:$0xff]  }
  0x1b   : > { %176 = vst [vmem:[%s3395_s30 + $0x24] sm:$0xff] %v175_v5   ;;  %v223_v18 = vld [vmem:[%s3390_s29 + $0xf0] sm:$0xff]   ;;  %v227_v19 = vld [vmem:[%s3390_s29 + $0xf8] sm:$0xf] }
  0x1c   : > { %180 = vst [vmem:[%s3395_s30 + $0x2c] sm:$0xff] %v179_v6  }
  0x1d   : > { %184 = vst [vmem:[%s3395_s30 + $0x34] sm:$0xff] %v183_v7  }
  0x1e   : > { %188 = vst [vmem:[%s3395_s30 + $0x3c] sm:$0xff] %v187_v8  }
  0x1f   : > { %192 = vst [vmem:[%s3395_s30 + $0x44] sm:$0xf] %v191_v9 }
  0x20   : > { %194 = vst [vmem:[%s3395_s30 + $0x48] sm:$0xff] %v193_v10  }
  0x21   : > { %198 = vst [vmem:[%s3395_s30 + $0x50] sm:$0xff] %v197_v11  }
  0x22   : > { %202 = vst [vmem:[%s3395_s30 + $0x58] sm:$0xff] %v201_v12  }
  0x23   : > { %206 = vst [vmem:[%s3395_s30 + $0x60] sm:$0xff] %v205_v13  }
  0x24   : > { %210 = vst [vmem:[%s3395_s30 + $0x68] sm:$0xf] %v209_v14 }
  0x25   : > { %212 = vst [vmem:[%s3395_s30 + $0x6c] sm:$0xff] %v211_v15  }
  0x26   : > { %216 = vst [vmem:[%s3395_s30 + $0x74] sm:$0xff] %v215_v16  }
  0x27   : > { %220 = vst [vmem:[%s3395_s30 + $0x7c] sm:$0xff] %v219_v17  }
  0x28   : > { %224 = vst [vmem:[%s3395_s30 + $0x84] sm:$0xff] %v223_v18  }
  0x29   : > { %228 = vst [vmem:[%s3395_s30 + $0x8c] sm:$0xf] %v227_v19 }
  0x2a PF: > { %p2689_p10 = scmp.ge.s32.totalorder %s3313_s15, 1  ;;  %p323_p11 = scmp.lt.s32.totalorder %s3313_s15, 3 }
  0x2c   : > { %p324_p12 = pnand %p2689_p10, %p323_p11 }
  0x2e   : > { %327 = sbr.rel (%p324_p12) target bundleno = 784 (0x310), region = 69 }
  0x33   : > { %v2691_v20 = vld [vmem:[%s4283_s1 + $0x2] sm:$0x3]  ;;  %vm417_vm0 = vcmask 1041408   ;;  %v354_v21 = vld [vmem:[%s4283_s1] sm:$0x3]  ;;  %s3443_s8 = sand.u32 1, %s3305_s13  }
  0x34   : > { %v3446_v22 = vsel %vm417_vm0, %v2691_v20, 0  ;;  %v3449_v23 = vsel %vm417_vm0, %v354_v21, 0  ;;  %v2693_v24 = vld [vmem:[%s4283_s1 + $0x6] sm:$0x3]  ;;  %s3200_s11 = smul.u32 144, %s3443_s8  ;;  %vm404_vm1 = vcmask 31744  }
  0x35   : > { %428 = vmatpush.bf16.msra.mxu0 %v3446_v22  ;;  %489 = vmatpush.bf16.msra.mxu1 %v3449_v23  ;;  %v3458_v25 = vsel %vm417_vm0, %v2693_v24, 0  ;;  %v2692_v26 = vld [vmem:[%s4283_s1 + $0x4] sm:$0x3]  ;;  %v2696_v28 = vld [vmem:[%s4283_s1 + $0xc] sm:$0x3]  ;;  %s3028_s5 = sshll.u32 %s2684_s16, 1 }
  0x36   : > { %668 = vmatpush.bf16.msra.mxu3 %v3458_v25  ;;  %v3465_v27 = vsel %vm417_vm0, %v2692_v26, 0  ;;  %v2694_v29 = vld [vmem:[%s4283_s1 + $0x8] sm:$0x3]  ;;  %s3473_s27 = scalar_lea.vmem [#allocation2], %s3200_s11  ;;  %v3484_v33 = vsel %vm417_vm0, %v2696_v28, 0  ;;  %s2615_s9 = scalar_lea.hbm %s4285_s3, %s3028_s5 }
  0x37   : > { %v3476_v30 = vld [vmem:[%s3473_s27 + $0x24] sm:$0xff]  ;;  %592 = vmatpush.bf16.msra.mxu2 %v3465_v27  ;;  %v3487_v34 = vsel %vm417_vm0, %v2694_v29, 0  ;;  %v2697_v37 = vld [vmem:[%s4283_s1 + $0xe] sm:$0x3]  ;;  %vm538_vm2 = vsmask.f32 7424 }
  0x38   : > { %v3031_v31 = vld [vmem:[%s3473_s27] sm:$0xff]  ;;  %v3480_v32 = vld [vmem:[%s3473_s27 + $0x48] sm:$0xff]  ;;  %2718 = vmatmul.msk.bf16.vlgmr.msra.gmra.mxu0 %vm404_vm1, %v3476_v30  ;;  %v3500_v41 = vsel %vm417_vm0, %v2697_v37, 0  ;;  %v3521_v48 = vld [vmem:[%s3473_s27 + $0x10] sm:$0xff]   ;;  %s2619_s17 = sshll.u32 %s2615_s9, 4  ;;  %s2605_s16 = scalar_lea.sflag [#allocation4], %s3443_s8  ;;  %s2620_s17 = int_to_ptr.hbm [resolvable:$true] %s2619_s17 }
  0x39   : > { %v3060_v35 = vld [vmem:[%s3473_s27] sm:$0xff]   ;;  %v3107_v36 = vld [vmem:[%s3473_s27 + $0x8] sm:$0xff]   ;;  %744 = vmatpush.bf16.msrb.mxu0 %v3487_v34  ;;  %2734 = vmatmul.msk.bf16.vlgmr.msra.gmra.mxu1 %vm404_vm1, %v3031_v31  ;;  %v555_v52 = vshll.u32 %v3521_v48, 16  ;;  %v3529_v53 = vld [vmem:[%s3473_s27 + $0x50] sm:$0xff]  ;;  %v559_v0 = vshrl.u32 %v3521_v48, 16  ;;  %s3265_s19 = sshra.s32 %s2620_s17, 4  ;;  %s3266_s19 = int_to_ptr.hbm [resolvable:$true] %s3265_s19 }
  0x3a   : > { %v540_v38 = vshrl.u32 %v3060_v35, 16  ;;  %v542_v39 = vshll.u32 %v3060_v35, 16  ;;  %v547_v40 = vshll.u32 %v3107_v36, 16  ;;  %v2695_v42 = vld [vmem:[%s4283_s1 + $0xa] sm:$0x3]  ;;  %2761 = vmatmul.msk.bf16.vlgmr.msra.gmra.mxu3 %vm404_vm1, %v3480_v32  ;;  %v3524_v49 = vld [vmem:[%s3473_s27 + $0x2c] sm:$0xff]  ;;  %p3272_p2 = scmp.lt.s32.totalorder %s3266_s19, %s4285_s3 }
  0x3b   : > { %910 = vmatpush.bf16.msrb.mxu2 %v3484_v33  ;;  %v3508_v43 = vsel %vm417_vm0, %v2695_v42, 0  ;;  %985 = vmatpush.bf16.msrb.mxu3 %v3500_v41  ;;  %v3032_v50 = vld [vmem:[%s3473_s27 + $0x8] sm:$0xff]  ;;  %v551_v51 = vshrl.u32 %v3107_v36, 16  ;;  %v557_v55 = vrot.slane %v555_v52, 1  ;;  %v3537_v56 = vld [vmem:[%s3473_s27 + $0x18] sm:$0xff]   ;;  %v3033_v63 = vld [vmem:[%s3473_s27 + $0x10] sm:$0xff] }
  0x3c   : > { %v544_v44 = vrot.slane %v542_v39, 1  ;;  %v549_v45 = vrot.slane %v547_v40, 1  ;;  %853 = vmatpush.bf16.msrb.mxu1 %v3508_v43  ;;  %v517_v57 = vld [vmem:[%s3473_s27 + $0x1c] sm:$0x1]  ;;  %v532_v59 = vunpack.c.l.b16 %v3537_v56  ;;  %v3547_v62 = vld [vmem:[%s3473_s27 + $0x34] sm:$0xff]  ;;  %v3109_v17 = vld [vmem:[%s3473_s27 + $0x48] sm:$0xff]  }
  0x3d   : > { %v533_v60 = vunpack.c.l.b16 %v517_v57  ;;  %v3552_v2 = vld [vmem:[%s3473_s27 + $0x58] sm:$0xff]  ;;  %v561_v3 = vor.u32 %v559_v0, %v557_v55  ;;  %v2748_v8 = vld [vmem:[%s3473_s27 + $0x60] sm:$0xf]  ;;  %v803_v19 = vshll.u32 %v3109_v17, 16  ;;  %v3110_v20 = vld [vmem:[%s3473_s27 + $0x50] sm:$0xff]   ;;  %v801_v24 = vshrl.u32 %v3109_v17, 16 }
  0x3e   : > { %v545_v46 = vor.u32 %v544_v44, %v540_v38  ;;  %v553_v54 = vor.u32 %v551_v51, %v549_v45  ;;  %v3563_v6 = vld [vmem:[%s3473_s27 + $0x3c] sm:$0xff]   ;;  %v377_v7 = vld [vmem:[%s3473_s27 + $0x18] sm:$0xf]  ;;  %v641_v13 = vunpack.c.l.b16 %v2748_v8  ;;  %v808_v28 = vshll.u32 %v3110_v20, 16  ;;  %v3593_v35 = vld [vmem:[%s3473_s27 + $0x6c] sm:$0xff]  ;;  %s3267_s20 = scalar_lea.hbm %s3266_s19, 2 }
  0x3f   : > { %1238 = vmatpush.bf16.msra.mxu3 %v3465_v27  ;;  %v537_v61 = vpack.c.b16 %v533_v60, %v532_v59  ;;  %v2698_v9 = vld [vmem:[%s4283_s1 + $0x10] sm:$0x3]  ;;  %v399_v10 = vunpack.c.l.b16 %v3563_v6  ;;  %v462_v11 = vunpack.c.l.b16 %v377_v7  ;;  %v805_v26 = vrot.slane %v803_v19, 1  ;;  %v3599_v37 = vld [vmem:[%s3473_s27 + $0x28] sm:$0xff]   ;;  %v3111_v39 = vld [vmem:[%s3473_s27 + $0x58] sm:$0xff]   ;;  %p3268_p13 = scmp.ne.s32.totalorder %s3266_s19, %s3267_s20  ;;  %s3271_s26 = scalar_lea.hbm %s4285_s3, 4 }
  0x40   : > { %1129 = vmatpush.bf16.msra.mxu1 %v3446_v22  ;;  %v3515_v47 = vsel %vm538_vm2, %v545_v46, %v549_v45  ;;  %v3541_v58 = vsel %vm538_vm2, %v553_v54, %v557_v55  ;;  %v3574_v12 = vsel %vm417_vm0, %v2698_v9, 0  ;;  %v3579_v16 = vpack.c.b16 %v641_v13, %v641_v13  ;;  %v3613_v40 = vld [vmem:[%s3473_s27 + $0x4] sm:$0xff]   ;;  %v3625_v52 = vld [vmem:[%s3473_s27 + $0x74] sm:$0xff]  ;;  %p3273_p3 = scmp.lt.s32.totalorder %s3271_s26, %s3267_s20 }
  0x41   : > { %2738 = vmatmul.msk.bf16.vlgmr.msra.gmra.mxu2 %vm404_vm1, %v3515_v47  ;;  %v563_v1 = vshll.u32 %v537_v61, 16  ;;  %1094 = vmatpush.bf16.msra.mxu0 %v3574_v12  ;;  %v3577_v14 = vpack.c.b16 %v399_v10, %v399_v10  ;;  %v466_v15 = vpack.c.b16 %v462_v11, %v462_v11  ;;  %v567_v18 = vshrl.u32 %v537_v61, 16  ;;  %v2795_v51 = vld [vmem:[%s3473_s27 + $0x64] sm:$0x1]  ;;  %v3643_v61 = vld [vmem:[%s3473_s27 + $0xc] sm:$0xff]   ;;  %v3654_v8 = vld [vmem:[%s3473_s27 + $0x38] sm:$0xff]   ;;  %p3269_p0 = pnand %p3268_p13, %p3374_p6 }
  0x42   : > { %1157 = vmatpush.bf16.msra.mxu2 %v3449_v23  ;;  %v806_v29 = vor.u32 %v805_v26, %v801_v24  ;;  %v810_v31 = vrot.slane %v808_v28, 1  ;;  %v3070_v38 = vunpack.c.h.b16 %v3521_v48  ;;  %v812_v44 = vshrl.u32 %v3110_v20, 16  ;;  %v2771_v9 = vld [vmem:[%s3473_s27 + $0x84] sm:$0xf]  ;;  %v3044_v28 = vld [vmem:[%s3473_s27 + $0xc] sm:$0xff]  ;;  %p3274_p4 = por %p3273_p3, %p3272_p2 }
  0x43   : > { %v565_v4 = vrot.slane %v563_v1, 1  ;;  %v816_v45 = vshll.u32 %v3111_v39, 16  ;;  %v795_v57 = vunpack.c.l.b16 %v2795_v51  ;;  %v717_v10 = vunpack.c.l.b16 %v2771_v9  ;;  %v3043_v20 = vld [vmem:[%s3473_s27 + $0x4] sm:$0xff]  ;;  %p3270_p1 = pneg %p3269_p0 }
  0x44   : > { %v3596_v36 = vsel %vm538_vm2, %v806_v29, %v810_v31  ;;  %v3615_v42 = vpack.c.b16 %v532_v59, %v3070_v38  ;;  %v814_v46 = vor.u32 %v812_v44, %v810_v31  ;;  %v3632_v59 = vld [vmem:[%s3473_s27 + $0x30] sm:$0xff]   ;;  %v958_v13 = vunpack.c.h.b16 %v3563_v6  ;;  %v3166_v26 = vld [vmem:[%s3473_s27 + $0x24] sm:$0xff]  }
  0x45   : > { %v3560_v5 = vsel %vm538_vm2, %v561_v3, %v565_v4  ;;  %v3588_v21 = vor.u32 %v567_v18, %v565_v4  ;;  %v818_v48 = vrot.slane %v816_v45, 1  ;;  %v3648_v4 = vld [vmem:[%s3473_s27 + $0x7c] sm:$0xff]  ;;  %v3315_v24 = vmov 0   ;;  %v3168_v31 = vld [vmem:[%s3473_s27 + $0x2c] sm:$0xff]   ;;  %p3275_p5 = pnand %p3274_p4, %p3270_p1 }
  0x46   : > { %v2400_v18 = vld [vmem:[%s4284_s2] sm:$0xff]  ;;  %v3673_v19 = vpack.c.b16 %v958_v13, %v958_v13  ;;  %3241 = vset.pattern.permute.xlu0 %v3315_v24  ;;  %3242 = vset.pattern.permute.xlu1 %v3315_v24  ;;  %v883_v6 = vunpack.c.h.b16 %v3537_v56  ;;  %v1044_v29 = vshll.u32 %v3043_v20, 16  ;;  %v1191_v38 = vshll.u32 %v3166_v26, 16  ;;  %v2401_v44 = vld [vmem:[%s4284_s2 + $0x8] sm:$0xff] }
  0x47   : > { %v3628_v54 = vsel %vm538_vm2, %v814_v46, %v818_v48  ;;  %2409 = vperm.xlu0 %3241, %v2400_v18   ;;  %3243 = vset.pattern.permute.xlu2 %v3315_v24  ;;  %v1042_v56 = vshrl.u32 %v3043_v20, 16  ;;  %v1049_v46 = vshll.u32 %v3044_v28, 16  ;;  %v3045_v20 = vld [vmem:[%s3473_s27 + $0x14] sm:$0xff] }
  0x48   : > { %2719 = vmatmul.msk.bf16.gmra.mxu0 %vm404_vm1, %v3524_v49  ;;  %v1046_v45 = vrot.slane %v1044_v29, 1  ;;  %v1193_v51 = vrot.slane %v1191_v38, 1  ;;  %v3170_v24 = vld [vmem:[%s3473_s27 + $0x34] sm:$0xff]  }
  0x49   : > { %2735 = vmatmul.msk.bf16.gmra.mxu1 %vm404_vm1, %v3032_v50  ;;  %v3621_v50 = vld [vmem:[%s3473_s27 + $0x60] sm:$0xf] }
  0x4a   : > { %2762 = vmatmul.msk.bf16.gmra.mxu3 %vm404_vm1, %v3529_v53  ;;  %4295 = vst [vmem:[#allocation6_spill] sm:$0xff] %v3621_v50  ;;  %v4286_v55 = vunpack.c.l.b16 %v3621_v50 }
  0x4c   : > { %v799_v60 = vpack.c.b16 %v795_v57, %v4286_v55  ;;  %v1196_v57 = vshll.u32 %v3168_v31, 16 }
  0x4e   : > { %v824_v0 = vshll.u32 %v799_v60, 16  ;;  %v828_v11 = vshrl.u32 %v799_v60, 16  ;;  %v1047_v60 = vor.u32 %v1046_v45, %v1042_v56  ;;  %v1057_v56 = vshll.u32 %v3045_v20, 16 }
  0x4f   : > { %2414 = vperm.xlu0 %3241, %v2401_v44   ;;  %v1053_v44 = vshrl.u32 %v3044_v28, 16  ;;  %v1200_v45 = vshrl.u32 %v3168_v31, 16 }
  0x50   : > { %v826_v3 = vrot.slane %v824_v0, 1 }
  0x51   : > { %2739 = vmatmul.msk.bf16.gmra.mxu2 %vm404_vm1, %v3541_v58 }
  0x52   : > { %v3668_v17 = vor.u32 %v828_v11, %v826_v3 }
  0x58   : > { %2720 = vmatmul.msk.bf16.gmra.mxu0 %vm404_vm1, %v3547_v62 }
  0x59   : > { %2736 = vmatmul.msk.bf16.gmra.mxu1 %vm404_vm1, %v3033_v63  ;;  %v820_v63 = vshrl.u32 %v3111_v39, 16  ;;  %v3686_v39 = vpack.c.b16 %v883_v6, %v883_v6  ;;  %v2403_v6 = vld [vmem:[%s4284_s2 + $0x18] sm:$0xff] }
  0x5a   : > { %2763 = vmatmul.msk.bf16.gmra.mxu3 %vm404_vm1, %v3552_v2 }
  0x5b   : > { %v822_v1 = vor.u32 %v820_v63, %v818_v48  ;;  %v1189_v48 = vshrl.u32 %v3166_v26, 16  ;;  %v1051_v63 = vrot.slane %v1049_v46, 1  ;;  %v1204_v46 = vshll.u32 %v3170_v24, 16 }
  0x5d   : > { %v3651_v7 = vsel %vm538_vm2, %v822_v1, %v826_v3  ;;  %v1194_v0 = vor.u32 %v1193_v51, %v1189_v48  ;;  %v1198_v1 = vrot.slane %v1196_v57, 1  ;;  %v2402_v3 = vld [vmem:[%s4284_s2 + $0x10] sm:$0xff]  ;;  %v3697_v11 = vsel %vm538_vm2, %v1047_v60, %v1051_v63 }
  0x5e   : > { %2419 = vperm.xlu1 %3242, %v2402_v3   ;;  %v1055_v48 = vor.u32 %v1053_v44, %v1051_v63  ;;  %v1059_v51 = vrot.slane %v1057_v56, 1  ;;  %v3169_v63 = vld [vmem:[%s3473_s27 + $0x3c] sm:$0xf]  ;;  %v3171_v44 = vld [vmem:[%s3473_s27 + $0x3c] sm:$0x10] }
  0x5f   : > { %v1199_v18 = vsel %vm538_vm2, %v1194_v0, %v1198_v1  ;;  %v1202_v60 = vor.u32 %v1200_v45, %v1198_v1  ;;  %v1206_v0 = vrot.slane %v1204_v46, 1  ;;  %v3143_v56 = vor.u32 %v3171_v44, %v3169_v63 }
  0x60   : > { %v3717_v31 = vsel %vm538_vm2, %v1055_v48, %v1059_v51 }
  0x61   : > { %2740 = vmatmul.msk.bf16.gmra.mxu2 %vm404_vm1, %v3560_v5  ;;  %v1212_v55 = vshll.u32 %v3143_v56, 16 }
  0x66   : > { %2424 = vperm.xlu1 %3242, %v2403_v6   ;;  %v1207_v6 = vsel %vm538_vm2, %v1202_v60, %v1206_v0 }
  0x68   : > { %2721 = vmatmul.msk.bf16.gmra.mxu0 %vm404_vm1, %v3577_v14 }
  0x69   : > { %2737 = vmatmul.msk.bf16.gmra.mxu1 %vm404_vm1, %v466_v15  ;;  %v3666_v15 = vpack.c.b16 %v717_v10, %v717_v10 }
  0x6a   : > { %2764 = vmatmul.msk.bf16.gmra.mxu3 %vm404_vm1, %v3579_v16 }
  0x71   : > { %2741 = vmatmul.msk.bf16.gmra.mxu2 %vm404_vm1, %v3588_v21 }
  0x78   : > { %2784 = vmatmul.msk.bf16.vlgmr.msrb.gmra.mxu0 %vm404_vm1, %v3593_v35 }
  0x79   : > { %2796 = vmatmul.msk.bf16.vlgmr.msrb.gmra.mxu1 %vm404_vm1, %v3596_v36  ;;  %1273 = vmatpush.bf16.msrb.mxu0 %v3458_v25 }
  0x7a   : > { %2811 = vmatmul.msk.bf16.vlgmr.msrb.gmra.mxu3 %vm404_vm1, %v3599_v37  ;;  %1308 = vmatpush.bf16.msrb.mxu1 %v3487_v34 }
  0x7b   : > { %1449 = vmatpush.bf16.msrb.mxu3 %v3484_v33 }
  0x81   : > { %2800 = vmatmul.msk.bf16.vlgmr.msrb.gmra.mxu2 %vm404_vm1, %v3613_v40 }
  0x82   : > { %1414 = vmatpush.bf16.msrb.mxu2 %v3508_v43 }
  0x88   : > { %2785 = vmatmul.msk.bf16.gmra.mxu0 %vm404_vm1, %v3625_v52 }
  0x89   : > { %2797 = vmatmul.msk.bf16.gmra.mxu1 %vm404_vm1, %v3628_v54 }
  0x8a   : > { %2812 = vmatmul.msk.bf16.gmra.mxu3 %vm404_vm1, %v3632_v59 }
  0x91   : > { %2801 = vmatmul.msk.bf16.gmra.mxu2 %vm404_vm1, %v3643_v61 }
  0x98   : > { %2786 = vmatmul.msk.bf16.gmra.mxu0 %vm404_vm1, %v3648_v4 }
  0x99   : > { %2798 = vmatmul.msk.bf16.gmra.mxu1 %vm404_vm1, %v3651_v7 }
  0x9a   : > { %2813 = vmatmul.msk.bf16.gmra.mxu3 %vm404_vm1, %v3654_v8 }
  0xa1   : > { %2802 = vmatmul.msk.bf16.gmra.mxu2 %vm404_vm1, %v3615_v42 }
  0xa8   : > { %2787 = vmatmul.msk.bf16.gmra.mxu0 %vm404_vm1, %v3666_v15 }
  0xa9   : > { %2799 = vmatmul.msk.bf16.gmra.mxu1 %vm404_vm1, %v3668_v17 }
  0xaa   : > { %2814 = vmatmul.msk.bf16.gmra.mxu3 %vm404_vm1, %v3673_v19 }
  0xb1   : > { %2803 = vmatmul.msk.bf16.gmra.mxu2 %vm404_vm1, %v3686_v39 }
  0xb5   : > { %v430_v9 = vpop.f32.mrf.mxu0 }
  0xb6   : > { %v491_v10 = vpop.f32.mrf.mxu1 }
  0xb7   : > { %v492_v13 = vadd.f32 %v491_v10, %v430_v9 }
  0xb8   : > { %2831 = vmatmul.msk.bf16.vlgmr.msra.gmra.mxu0 %vm404_vm1, %v3697_v11 }
  0xb9   : > { %2835 = vmatmul.msk.bf16.vlgmr.msra.gmra.mxu1 %vm404_vm1, %v3515_v47  ;;  %1484 = vmatpush.bf16.msra.mxu0 %v3500_v41 }
  0xba   : > { %2845 = vmatmul.msk.bf16.vlgmr.msra.gmra.mxu3 %vm404_vm1, %v1199_v18  ;;  %1590 = vmatpush.bf16.msra.mxu1 %v3574_v12 }
  0xbb   : > { %1653 = vmatpush.bf16.msra.mxu3 %v3449_v23 }
  0xbd   : > { %v670_v26 = vpop.f32.mrf.mxu3  ;;  %v432_v29 = vpop.f32.mrf.mxu0 }
  0xbe   : > { %v493_v38 = vpop.f32.mrf.mxu1 }
  0xbf   : > { %v494_v47 = vadd.f32 %v493_v38, %v432_v29  ;;  %v2829_v29 = vld [vmem:[%s3473_s27 + $0x1c] sm:$0xf]  ;;  %v3046_v38 = vld [vmem:[%s3473_s27 + $0x1c] sm:$0x10] }
  0xc0   : > { %v2830_v1 = vor.u32 %v3046_v38, %v2829_v29  ;;  %v1214_v38 = vrot.slane %v1212_v55, 1 }
  0xc1   : > { %2839 = vmatmul.msk.bf16.vlgmr.msra.gmra.mxu2 %vm404_vm1, %v3476_v30 }
  0xc2   : > { %1625 = vmatpush.bf16.msra.mxu2 %v3446_v22  ;;  %v1065_v60 = vshll.u32 %v2830_v1, 16 }
  0xc4   : > { %v594_v57 = vpop.f32.mrf.mxu2  ;;  %v1067_v50 = vrot.slane %v1065_v60, 1  ;;  %v1069_v60 = vshrl.u32 %v2830_v1, 16 }
  0xc5   : > { %v613_v28 = vadd.f32 %v594_v57, %v492_v13  ;;  %v672_v3 = vpop.f32.mrf.mxu3  ;;  %v435_v9 = vpop.f32.mrf.mxu0  ;;  %v1061_v57 = vshrl.u32 %v3045_v20, 16  ;;  %v2406_v20 = vld [vmem:[%s4284_s2 + $0x30] sm:$0xff] }
  0xc6   : > { %v496_v10 = vpop.f32.mrf.mxu1  ;;  %2439 = vperm.xlu0 %3241, %v2406_v20  }
  0xc7   : > { %v3719_v18 = vadd.f32 %v670_v26, %v613_v28  ;;  %v497_v30 = vadd.f32 %v496_v10, %v435_v9  ;;  %v1208_v10 = vshrl.u32 %v3170_v24, 16 }
  0xc8   : > { %2832 = vmatmul.msk.bf16.gmra.mxu0 %vm404_vm1, %v3717_v31 }
  0xc9   : > { %2836 = vmatmul.msk.bf16.gmra.mxu1 %vm404_vm1, %v3541_v58  ;;  %v1063_v58 = vor.u32 %v1061_v57, %v1059_v51  ;;  %v1210_v29 = vor.u32 %v1208_v10, %v1206_v0 }
  0xca   : > { %2846 = vmatmul.msk.bf16.gmra.mxu3 %vm404_vm1, %v1207_v6 }
  0xcb   : > { %v1215_v51 = vsel %vm538_vm2, %v1210_v29, %v1214_v38  ;;  %v2405_v29 = vld [vmem:[%s4284_s2 + $0x28] sm:$0xff] }
  0xcc   : > { %v596_v13 = vpop.f32.mrf.mxu2 }
  0xcd   : > { %v614_v26 = vadd.f32 %v596_v13, %v494_v47  ;;  %v675_v45 = vpop.f32.mrf.mxu3  ;;  %v437_v46 = vpop.f32.mrf.mxu0  ;;  %v3739_v13 = vsel %vm538_vm2, %v1063_v58, %v1067_v50 }
  0xce   : > { %v498_v48 = vpop.f32.mrf.mxu1 }
  0xcf   : > { %v3731_v28 = vadd.f32 %v672_v3, %v614_v26  ;;  %v499_v9 = vadd.f32 %v498_v48, %v437_v46  ;;  %v2404_v26 = vld [vmem:[%s4284_s2 + $0x20] sm:$0xff] }
  0xd0   : > { %2429 = vperm.xlu2 %3243, %v2404_v26  }
  0xd1   : > { %2840 = vmatmul.msk.bf16.gmra.mxu2 %vm404_vm1, %v3524_v49 }
  0xd4   : > { %v599_v6 = vpop.f32.mrf.mxu2 }
  0xd5   : > { %v615_v63 = vadd.f32 %v599_v6, %v497_v30  ;;  %v677_v47 = vpop.f32.mrf.mxu3  ;;  %v440_v44 = vpop.f32.mrf.mxu0  ;;  %v3756_v6 = vor.u32 %v1069_v60, %v1067_v50 }
  0xd6   : > { %v501_v3 = vpop.f32.mrf.mxu1 }
  0xd7   : > { %v3741_v24 = vadd.f32 %v675_v45, %v615_v63  ;;  %v502_v49 = vadd.f32 %v501_v3, %v440_v44  ;;  %v3192_v3 = vld [vmem:[%s3473_s27 + $0x6c] sm:$0xff]  }
  0xd8   : > { %2833 = vmatmul.msk.bf16.gmra.mxu0 %vm404_vm1, %v3739_v13  ;;  %2434 = vperm.xlu2 %3243, %v2405_v29  }
  0xd9   : > { %2837 = vmatmul.msk.bf16.gmra.mxu1 %vm404_vm1, %v3560_v5  ;;  %v1216_v5 = vshrl.u32 %v3143_v56, 16 }
  0xda   : > { %2847 = vmatmul.msk.bf16.gmra.mxu3 %vm404_vm1, %v1215_v51 }
  0xdc   : > { %v601_v55 = vpop.f32.mrf.mxu2 }
  0xdd   : > { %v616_v0 = vadd.f32 %v601_v55, %v499_v9  ;;  %v680_v30 = vpop.f32.mrf.mxu3  ;;  %v442_v45 = vpop.f32.mrf.mxu0 }
  0xde   : > { %v503_v46 = vpop.f32.mrf.mxu1 }
  0xdf   : > { %v3752_v48 = vadd.f32 %v677_v47, %v616_v0  ;;  %v504_v57 = vadd.f32 %v503_v46, %v442_v45  ;;  %v1218_v47 = vor.u32 %v1216_v5, %v1214_v38  ;;  %v3194_v38 = vld [vmem:[%s3473_s27 + $0x74] sm:$0xff]   ;;  %v1367_v0 = vshll.u32 %v3192_v3, 16 }
  0xe0   : > { %v1365_v46 = vshrl.u32 %v3192_v3, 16  ;;  %v1372_v60 = vshll.u32 %v3194_v38, 16 }
  0xe1   : > { %2841 = vmatmul.msk.bf16.gmra.mxu2 %vm404_vm1, %v3547_v62 }
  0xe4   : > { %v604_v10 = vpop.f32.mrf.mxu2 }
  0xe5   : > { %v617_v58 = vadd.f32 %v604_v10, %v502_v49  ;;  %v682_v9 = vpop.f32.mrf.mxu3  ;;  %v445_v63 = vpop.f32.mrf.mxu0 }
  0xe6   : > { %v506_v20 = vpop.f32.mrf.mxu1 }
  0xe7   : > { %v3761_v44 = vadd.f32 %v680_v30, %v617_v58  ;;  %v507_v62 = vadd.f32 %v506_v20, %v445_v63 }
  0xe8   : > { %2834 = vmatmul.msk.bf16.gmra.mxu0 %vm404_vm1, %v3756_v6 }
  0xe9   : > { %2838 = vmatmul.msk.bf16.gmra.mxu1 %vm404_vm1, %v3588_v21  ;;  %v1369_v21 = vrot.slane %v1367_v0, 1  ;;  %v1376_v0 = vshrl.u32 %v3194_v38, 16 }
  0xea   : > { %2848 = vmatmul.msk.bf16.gmra.mxu3 %vm404_vm1, %v1218_v47 }
  0xec   : > { %v606_v50 = vpop.f32.mrf.mxu2 }
  0xed   : > { %v618_v1 = vadd.f32 %v606_v50, %v504_v57  ;;  %v685_v56 = vpop.f32.mrf.mxu3  ;;  %v447_v49 = vpop.f32.mrf.mxu0 }
  0xee   : > { %v508_v51 = vpop.f32.mrf.mxu1 }
  0xef   : > { %v3769_v55 = vadd.f32 %v682_v9, %v618_v1  ;;  %v1374_v9 = vrot.slane %v1372_v60, 1 }
  0xf1   : > { %2842 = vmatmul.msk.bf16.gmra.mxu2 %vm404_vm1, %v3577_v14  ;;  %v1370_v14 = vor.u32 %v1369_v21, %v1365_v46  ;;  %v1378_v60 = vor.u32 %v1376_v0, %v1374_v9 }
  0xf3   : > { %v3787_v20 = vsel %vm538_vm2, %v1370_v14, %v1374_v9 }
  0xf4   : > { %v609_v30 = vpop.f32.mrf.mxu2 }
  0xf5   : > { %v619_v26 = vadd.f32 %v609_v30, %v507_v62  ;;  %v687_v45 = vpop.f32.mrf.mxu3  ;;  %v746_v5 = vpop.f32.mrf.mxu0 }
  0xf6   : > { %v855_v10 = vpop.f32.mrf.mxu1  ;;  %v765_v58 = vadd.f32 %v746_v5, %v3719_v18 }
  0xf7   : > { %v3774_v57 = vadd.f32 %v685_v56, %v619_v26  ;;  %v3196_v56 = vld [vmem:[%s3473_s27 + $0x7c] sm:$0xff]  }
  0xf8   : > { %v874_v29 = vadd.f32 %v855_v10, %v765_v58  ;;  %2849 = vmatmul.msk.bf16.vlgmr.msrb.gmra.mxu0 %vm404_vm1, %v3593_v35  ;;  %v1380_v30 = vshll.u32 %v3196_v56, 16  ;;  %v1384_v0 = vshrl.u32 %v3196_v56, 16 }
  0xf9   : > { %2853 = vmatmul.msk.bf16.vlgmr.msrb.gmra.mxu1 %vm404_vm1, %v3596_v36  ;;  %1681 = vmatpush.bf16.msrb.mxu0 %v3465_v27 }
  0xfa   : > { %2869 = vmatmul.msk.bf16.vlgmr.msrb.gmra.mxu3 %vm404_vm1, %v3599_v37  ;;  %1716 = vmatpush.bf16.msrb.mxu1 %v3458_v25  ;;  %v1382_v5 = vrot.slane %v1380_v30, 1 }
  0xfb   : > { %1786 = vmatpush.bf16.msrb.mxu3 %v3508_v43 }
  0xfc   : > { %v611_v63 = vpop.f32.mrf.mxu2 }
  0xfd   : > { %v987_v18 = vpop.f32.mrf.mxu3  ;;  %v748_v47 = vpop.f32.mrf.mxu0  ;;  %v3195_v63 = vld [vmem:[%s3473_s27 + $0x84] sm:$0xf] }
  0xfe   : > { %v857_v62 = vpop.f32.mrf.mxu1  ;;  %v766_v50 = vadd.f32 %v748_v47, %v3731_v28 }
 0x100   : > { %v875_v1 = vadd.f32 %v857_v62, %v766_v50 }
 0x101   : > { %2865 = vmatmul.msk.bf16.vlgmr.msrb.gmra.mxu2 %vm404_vm1, %v3787_v20 }
 0x102   : > { %1751 = vmatpush.bf16.msrb.mxu2 %v3487_v34 }
 0x104   : > { %v912_v3 = vpop.f32.mrf.mxu2 }
 0x105   : > { %v931_v49 = vadd.f32 %v912_v3, %v874_v29  ;;  %v989_v51 = vpop.f32.mrf.mxu3  ;;  %v751_v26 = vpop.f32.mrf.mxu0  ;;  %v3804_v29 = vsel %vm538_vm2, %v1378_v60, %v1382_v5 }
 0x106   : > { %v860_v45 = vpop.f32.mrf.mxu1  ;;  %v767_v28 = vadd.f32 %v751_v26, %v3741_v24  ;;  %4296 = vst [vmem:[#allocation7_spill] sm:$0xff] %v3804_v29 }
 0x107   : > { %v3794_v46 = vadd.f32 %v987_v18, %v931_v49  ;;  %v3197_v18 = vld [vmem:[%s3473_s27 + $0x84] sm:$0x10] }
 0x108   : > { %v876_v21 = vadd.f32 %v860_v45, %v767_v28  ;;  %2850 = vmatmul.msk.bf16.gmra.mxu0 %vm404_vm1, %v3625_v52  ;;  %v3190_v50 = vor.u32 %v3197_v18, %v3195_v63 }
 0x109   : > { %2854 = vmatmul.msk.bf16.gmra.mxu1 %vm404_vm1, %v3628_v54 }
 0x10a   : > { %2870 = vmatmul.msk.bf16.gmra.mxu3 %vm404_vm1, %v3632_v59  ;;  %v1388_v30 = vshll.u32 %v3190_v50, 16 }
 0x10c   : > { %v914_v38 = vpop.f32.mrf.mxu2 }
 0x10d   : > { %v932_v10 = vadd.f32 %v914_v38, %v875_v1  ;;  %v992_v58 = vpop.f32.mrf.mxu3  ;;  %v753_v14 = vpop.f32.mrf.mxu0  ;;  %v1390_v38 = vrot.slane %v1388_v30, 1 }
 0x10e   : > { %v862_v24 = vpop.f32.mrf.mxu1  ;;  %v768_v62 = vadd.f32 %v753_v14, %v3752_v48  ;;  %v1386_v48 = vor.u32 %v1384_v0, %v1382_v5  ;;  %v3047_v0 = vld [vmem:[%s3473_s27 + $0x28] sm:$0xff] }
 0x10f   : > { %v3808_v47 = vadd.f32 %v989_v51, %v932_v10 }
 0x110   : > { %v877_v9 = vadd.f32 %v862_v24, %v768_v62 }
 0x111   : > { %2866 = vmatmul.msk.bf16.gmra.mxu2 %vm404_vm1, %v3804_v29 }
 0x114   : > { %v917_v3 = vpop.f32.mrf.mxu2 }
 0x115   : > { %v933_v49 = vadd.f32 %v917_v3, %v876_v21  ;;  %v994_v1 = vpop.f32.mrf.mxu3  ;;  %v756_v26 = vpop.f32.mrf.mxu0 }
 0x116   : > { %v865_v45 = vpop.f32.mrf.mxu1  ;;  %v769_v60 = vadd.f32 %v756_v26, %v3761_v44 }
 0x117   : > { %v3813_v28 = vadd.f32 %v992_v58, %v933_v49  ;;  %v3823_v58 = vsel %vm538_vm2, %v1386_v48, %v1390_v38 }
 0x118   : > { %v878_v51 = vadd.f32 %v865_v45, %v769_v60  ;;  %2851 = vmatmul.msk.bf16.gmra.mxu0 %vm404_vm1, %v3648_v4  ;;  %4297 = vst [vmem:[#allocation8_spill] sm:$0xff] %v3823_v58  ;;  %v1392_v45 = vshrl.u32 %v3190_v50, 16  ;;  %v1543_v60 = vshll.u32 %v3047_v0, 16  ;;  %v1541_v50 = vshrl.u32 %v3047_v0, 16 }
 0x119   : > { %2855 = vmatmul.msk.bf16.gmra.mxu1 %vm404_vm1, %v3651_v7 }
 0x11a   : > { %2871 = vmatmul.msk.bf16.gmra.mxu3 %vm404_vm1, %v3654_v8 }
 0x11c   : > { %v919_v56 = vpop.f32.mrf.mxu2 }
 0x11d   : > { %v934_v21 = vadd.f32 %v919_v56, %v877_v9  ;;  %v997_v10 = vpop.f32.mrf.mxu3  ;;  %v758_v44 = vpop.f32.mrf.mxu0  ;;  %v3841_v56 = vor.u32 %v1392_v45, %v1390_v38 }
 0x11e   : > { %v867_v14 = vpop.f32.mrf.mxu1  ;;  %v770_v63 = vadd.f32 %v758_v44, %v3769_v55  ;;  %v3048_v55 = vld [vmem:[%s3473_s27 + $0x30] sm:$0xff]  ;;  %v1545_v44 = vrot.slane %v1543_v60, 1 }
 0x11f   : > { %v3825_v24 = vadd.f32 %v994_v1, %v934_v21  ;;  %4298 = vst [vmem:[#allocation9_spill] sm:$0xff] %v3841_v56 }
 0x120   : > { %v879_v5 = vadd.f32 %v867_v14, %v770_v63  ;;  %v1548_v14 = vshll.u32 %v3048_v55, 16 }
 0x121   : > { %2867 = vmatmul.msk.bf16.gmra.mxu2 %vm404_vm1, %v3823_v58 }
 0x124   : > { %v922_v18 = vpop.f32.mrf.mxu2 }
 0x125   : > { %v935_v62 = vadd.f32 %v922_v18, %v878_v51  ;;  %v999_v3 = vpop.f32.mrf.mxu3  ;;  %v761_v49 = vpop.f32.mrf.mxu0  ;;  %v1546_v18 = vor.u32 %v1545_v44, %v1541_v50 }
 0x126   : > { %v870_v9 = vpop.f32.mrf.mxu1  ;;  %v771_v26 = vadd.f32 %v761_v49, %v3774_v57 }
 0x127   : > { %v3831_v30 = vadd.f32 %v997_v10, %v935_v62  ;;  %v1550_v62 = vrot.slane %v1548_v14, 1 }
 0x128   : > { %v880_v1 = vadd.f32 %v870_v9, %v771_v26  ;;  %2852 = vmatmul.msk.bf16.gmra.mxu0 %vm404_vm1, %v3666_v15  ;;  %v3847_v9 = vpop.permute.xlu0 %2409 }
 0x129   : > { %2856 = vmatmul.msk.bf16.gmra.mxu1 %vm404_vm1, %v3668_v17 }
 0x12a   : > { %2872 = vmatmul.msk.bf16.gmra.mxu3 %vm404_vm1, %v3673_v19 }
 0x12c   : > { %v924_v51 = vpop.f32.mrf.mxu2 }
 0x12d   : > { %v936_v48 = vadd.f32 %v924_v51, %v879_v5  ;;  %v1002_v21 = vpop.f32.mrf.mxu3  ;;  %v763_v10 = vpop.f32.mrf.mxu0  ;;  %v3850_v51 = vsel %vm538_vm2, %v1546_v18, %v1550_v62 }
 0x12e   : > { %v872_v57 = vpop.f32.mrf.mxu1  ;;  %4299 = vst [vmem:[#allocation10_spill] sm:$0xff] %v3850_v51 }
 0x12f   : > { %v3843_v63 = vadd.f32 %v999_v3, %v936_v48  ;;  %v1552_v57 = vshrl.u32 %v3048_v55, 16 }
 0x131   : > { %2868 = vmatmul.msk.bf16.gmra.mxu2 %vm404_vm1, %v3841_v56 }
 0x134   : > { %v927_v49 = vpop.f32.mrf.mxu2 }
 0x135   : > { %v937_v5 = vadd.f32 %v927_v49, %v880_v1  ;;  %v1004_v38 = vpop.f32.mrf.mxu3  ;;  %v1096_v26 = vpop.f32.mrf.mxu0  ;;  %v3049_v1 = vld [vmem:[%s3473_s27 + $0x38] sm:$0xff] }
 0x136   : > { %v1131_v45 = vpop.f32.mrf.mxu1  ;;  %v1115_v3 = vadd.f32 %v1096_v26, %v3794_v46  ;;  %v1556_v50 = vshll.u32 %v3049_v1, 16  ;;  %v3873_v26 = vpop.permute.xlu1 %2419 }
 0x137   : > { %v3852_v0 = vadd.f32 %v1002_v21, %v937_v5  ;;  %v3865_v21 = vpop.permute.xlu0 %2414 }
 0x138   : > { %2873 = vmatmul.msk.bf16.vlgmr.msra.gmra.mxu0 %vm404_vm1, %v3697_v11  ;;  %v2442_v44 = vmul.f32 %v3847_v9, %v1115_v3  ;;  %v1558_v18 = vrot.slane %v1556_v50, 1  ;;  %v3050_v50 = vld [vmem:[%s3473_s27 + $0x40] sm:$0x10] }
 0x139   : > { %2901 = vmatmul.msk.bf16.vlgmr.msra.gmra.mxu1 %vm404_vm1, %v3850_v51  ;;  %1840 = vmatpush.bf16.msra.mxu0 %v3484_v33 }
 0x13a   : > { %2909 = vmatmul.msk.bf16.vlgmr.msra.gmra.mxu3 %vm404_vm1, %v3480_v32  ;;  %1894 = vmatpush.bf16.msra.mxu1 %v3500_v41  ;;  %v2462_v49 = vmul.f32 %v2442_v44, %v1115_v3 }
 0x13b   : > { %2035 = vmatpush.bf16.msra.mxu3 %v3446_v22  ;;  %v1554_v22 = vor.u32 %v1552_v57, %v1550_v62  ;;  %v2899_v57 = vld [vmem:[%s3473_s27 + $0x40] sm:$0xf] }
 0x13c   : > { %v929_v60 = vpop.f32.mrf.mxu2 }
 0x13d   : > { %v1240_v48 = vpop.f32.mrf.mxu3  ;;  %v1098_v46 = vpop.f32.mrf.mxu0 }
 0x13e   : > { %v1133_v10 = vpop.f32.mrf.mxu1  ;;  %v1116_v14 = vadd.f32 %v1098_v46, %v3808_v47 }
 0x140   : > { %v2443_v32 = vmul.f32 %v3865_v21, %v1116_v14 }
 0x141   : > { %2905 = vmatmul.msk.bf16.vlgmr.msra.gmra.mxu2 %vm404_vm1, %v3593_v35  ;;  %v3876_v35 = vsel %vm538_vm2, %v1554_v22, %v1558_v18 }
 0x142   : > { %2000 = vmatpush.bf16.msra.mxu2 %v3574_v12  ;;  %v2449_v5 = vadd.f32 %v2443_v32, %v2442_v44  ;;  %v2463_v38 = vmul.f32 %v2443_v32, %v1116_v14  ;;  %4300 = vst [vmem:[#allocation11_spill] sm:$0xff] %v3876_v35 }
 0x144   : > { %v1159_v55 = vpop.f32.mrf.mxu2  ;;  %v2469_v51 = vadd.f32 %v2463_v38, %v2462_v49 }
 0x145   : > { %v1160_v60 = vadd.f32 %v1159_v55, %v1131_v45  ;;  %v1242_v47 = vpop.f32.mrf.mxu3  ;;  %v1101_v46 = vpop.f32.mrf.mxu0  ;;  %v2900_v45 = vor.u32 %v3050_v50, %v2899_v57 }
 0x146   : > { %v1136_v56 = vpop.f32.mrf.mxu1  ;;  %v1117_v62 = vadd.f32 %v1101_v46, %v3813_v28  ;;  %v3890_v28 = vpop.permute.xlu1 %2424 }
 0x147   : > { %v3878_v58 = vadd.f32 %v1240_v48, %v1160_v60  ;;  %v1560_v60 = vshrl.u32 %v3049_v1, 16  ;;  %v1564_v46 = vshll.u32 %v2900_v45, 16 }
 0x148   : > { %v2444_v3 = vmul.f32 %v3873_v26, %v1117_v62  ;;  %2874 = vmatmul.msk.bf16.gmra.mxu0 %vm404_vm1, %v3717_v31 }
 0x149   : > { %2902 = vmatmul.msk.bf16.gmra.mxu1 %vm404_vm1, %v3876_v35 }
 0x14a   : > { %2910 = vmatmul.msk.bf16.gmra.mxu3 %vm404_vm1, %v3529_v53  ;;  %v2464_v44 = vmul.f32 %v2444_v3, %v1117_v62  ;;  %v2450_v48 = vadd.f32 %v2449_v5, %v2444_v3  ;;  %v1562_v62 = vor.u32 %v1560_v60, %v1558_v18  ;;  %v1566_v5 = vrot.slane %v1564_v46, 1  ;;  %v3898_v3 = vpop.permute.xlu2 %2429 }
 0x14c   : > { %v1161_v14 = vpop.f32.mrf.mxu2  ;;  %v2470_v49 = vadd.f32 %v2469_v51, %v2464_v44 }
 0x14d   : > { %v1162_v32 = vadd.f32 %v1161_v14, %v1133_v10  ;;  %v1245_v22 = vpop.f32.mrf.mxu3  ;;  %v1103_v38 = vpop.f32.mrf.mxu0 }
 0x14e   : > { %v1138_v55 = vpop.f32.mrf.mxu1  ;;  %v1118_v35 = vadd.f32 %v1103_v38, %v3825_v24 }
 0x14f   : > { %v3892_v29 = vadd.f32 %v1242_v47, %v1162_v32  ;;  %v3901_v32 = vsel %vm538_vm2, %v1562_v62, %v1566_v5 }
 0x150   : > { %v2445_v53 = vmul.f32 %v3890_v28, %v1118_v35 }
 0x151   : > { %2906 = vmatmul.msk.bf16.gmra.mxu2 %vm404_vm1, %v3625_v52 }
 0x152   : > { %v2451_v10 = vadd.f32 %v2450_v48, %v2445_v53  ;;  %v2465_v57 = vmul.f32 %v2445_v53, %v1118_v35 }
 0x154   : > { %v1164_v50 = vpop.f32.mrf.mxu2  ;;  %v2471_v44 = vadd.f32 %v2470_v49, %v2465_v57 }
 0x155   : > { %v1165_v51 = vadd.f32 %v1164_v50, %v1136_v56  ;;  %v1247_v1 = vpop.f32.mrf.mxu3  ;;  %v1106_v14 = vpop.f32.mrf.mxu0 }
 0x156   : > { %v1141_v47 = vpop.f32.mrf.mxu1  ;;  %v1119_v52 = vadd.f32 %v1106_v14, %v3831_v30 }
 0x157   : > { %v3903_v24 = vadd.f32 %v1245_v22, %v1165_v51  ;;  %v3913_v22 = vpop.permute.xlu2 %2434 }
 0x158   : > { %v2446_v18 = vmul.f32 %v3898_v3, %v1119_v52  ;;  %2875 = vmatmul.msk.bf16.gmra.mxu0 %vm404_vm1, %v3739_v13 }
 0x159   : > { %2903 = vmatmul.msk.bf16.gmra.mxu1 %vm404_vm1, %v3901_v32 }
 0x15a   : > { %2911 = vmatmul.msk.bf16.gmra.mxu3 %vm404_vm1, %v3552_v2  ;;  %v2466_v56 = vmul.f32 %v2446_v18, %v1119_v52  ;;  %v2452_v48 = vadd.f32 %v2451_v10, %v2446_v18  ;;  %v1568_v2 = vshrl.u32 %v2900_v45, 16  ;;  %v3921_v18 = vpop.permute.xlu0 %2439 }
 0x15c   : > { %v1166_v35 = vpop.f32.mrf.mxu2  ;;  %v2472_v60 = vadd.f32 %v2471_v44, %v2466_v56  ;;  %v3923_v44 = vor.u32 %v1568_v2, %v1566_v5 }
 0x15d   : > { %v1167_v49 = vadd.f32 %v1166_v35, %v1138_v55  ;;  %v1250_v38 = vpop.f32.mrf.mxu3  ;;  %v1108_v30 = vpop.f32.mrf.mxu0 }
 0x15e   : > { %v1143_v46 = vpop.f32.mrf.mxu1  ;;  %v1120_v62 = vadd.f32 %v1108_v30, %v3843_v63 }
 0x15f   : > { %v3915_v53 = vadd.f32 %v1247_v1, %v1167_v49 }
 0x160   : > { %v2447_v57 = vmul.f32 %v3913_v22, %v1120_v62 }
 0x161   : > { %2907 = vmatmul.msk.bf16.gmra.mxu2 %vm404_vm1, %v3648_v4 }
 0x162   : > { %v2453_v50 = vadd.f32 %v2452_v48, %v2447_v57  ;;  %v2467_v51 = vmul.f32 %v2447_v57, %v1120_v62 }
 0x164   : > { %v1169_v10 = vpop.f32.mrf.mxu2  ;;  %v2473_v14 = vadd.f32 %v2472_v60, %v2467_v51 }
 0x165   : > { %v1170_v55 = vadd.f32 %v1169_v10, %v1141_v47  ;;  %v1252_v52 = vpop.f32.mrf.mxu3  ;;  %v1111_v1 = vpop.f32.mrf.mxu0 }
 0x166   : > { %v1146_v56 = vpop.f32.mrf.mxu1  ;;  %v1121_v63 = vadd.f32 %v1111_v1, %v3852_v0 }
 0x167   : > { %v3925_v35 = vadd.f32 %v1250_v38, %v1170_v55 }
 0x168   : > { %v2448_v4 = vmul.f32 %v3921_v18, %v1121_v63  ;;  %2876 = vmatmul.msk.bf16.gmra.mxu0 %vm404_vm1, %v3756_v6 }
 0x169   : > { %2904 = vmatmul.msk.bf16.gmra.mxu1 %vm404_vm1, %v3923_v44 }
 0x16a   : > { %2912 = vmatmul.msk.bf16.gmra.mxu3 %vm404_vm1, %v3579_v16  ;;  %v3935_v45 = vadd.f32 %v2453_v50, %v2448_v4  ;;  %v2468_v5 = vmul.f32 %v2448_v4, %v1121_v63 }
 0x16c   : > { %v1171_v47 = vpop.f32.mrf.mxu2  ;;  %v3937_v49 = vadd.f32 %v2473_v14, %v2468_v5 }
 0x16d   : > { %v1172_v48 = vadd.f32 %v1171_v47, %v1143_v46  ;;  %v1255_v38 = vpop.f32.mrf.mxu3  ;;  %v1113_v0 = vpop.f32.mrf.mxu0 }
 0x16e   : > { %v1148_v60 = vpop.f32.mrf.mxu1 }
 0x16f   : > { %v1264_v30 = vadd.f32 %v1252_v52, %v1172_v48 }
 0x171   : > { %2908 = vmatmul.msk.bf16.gmra.mxu2 %vm404_vm1, %v3666_v15 }
 0x174   : > { %v1174_v62 = vpop.f32.mrf.mxu2 }
 0x175   : > { %v1175_v57 = vadd.f32 %v1174_v62, %v1146_v56  ;;  %v1257_v2 = vpop.f32.mrf.mxu3  ;;  %v1275_v51 = vpop.f32.mrf.mxu0 }
 0x176   : > { %v1310_v10 = vpop.f32.mrf.mxu1  ;;  %v1294_v50 = vadd.f32 %v1275_v51, %v3878_v58 }
 0x177   : > { %v3941_v16 = vadd.f32 %v1255_v38, %v1175_v57 }
 0x178   : > { %v1329_v55 = vadd.f32 %v1310_v10, %v1294_v50  ;;  %2913 = vmatmul.msk.bf16.vlgmr.msrb.gmra.mxu0 %vm404_vm1, %v3596_v36 }
 0x179   : > { %2917 = vmatmul.msk.bf16.vlgmr.msrb.gmra.mxu1 %vm404_vm1, %v3613_v40  ;;  %2063 = vmatpush.bf16.msrb.mxu0 %v3449_v23 }
 0x17a   : > { %2925 = vmatmul.msk.bf16.vlgmr.msrb.gmra.mxu3 %vm404_vm1, %v3697_v11  ;;  %2091 = vmatpush.bf16.msrb.mxu1 %v3465_v27 }
 0x17b   : > { %2161 = vmatpush.bf16.msrb.mxu3 %v3487_v34 }
 0x17c   : > { %v1176_v46 = vpop.f32.mrf.mxu2 }
 0x17d   : > { %v1451_v14 = vpop.f32.mrf.mxu3  ;;  %v1277_v52 = vpop.f32.mrf.mxu0 }
 0x17e   : > { %v1312_v58 = vpop.f32.mrf.mxu1  ;;  %v1295_v1 = vadd.f32 %v1277_v52, %v3892_v29 }
 0x180   : > { %v1330_v56 = vadd.f32 %v1312_v58, %v1295_v1 }
 0x181   : > { %2921 = vmatmul.msk.bf16.vlgmr.msrb.gmra.mxu2 %vm404_vm1, %v3599_v37 }
 0x182   : > { %2126 = vmatpush.bf16.msrb.mxu2 %v3458_v25 }
 0x184   : > { %v1416_v40 = vpop.f32.mrf.mxu2 }
 0x185   : > { %v1435_v63 = vadd.f32 %v1416_v40, %v1329_v55  ;;  %v1453_v4 = vpop.f32.mrf.mxu3  ;;  %v1280_v23 = vpop.f32.mrf.mxu0 }
 0x186   : > { %v1315_v5 = vpop.f32.mrf.mxu1  ;;  %v1296_v27 = vadd.f32 %v1280_v23, %v3903_v24 }
 0x187   : > { %v3957_v47 = vadd.f32 %v1451_v14, %v1435_v63 }
 0x188   : > { %v1331_v34 = vadd.f32 %v1315_v5, %v1296_v27  ;;  %2914 = vmatmul.msk.bf16.gmra.mxu0 %vm404_vm1, %v3628_v54 }
 0x189   : > { %2918 = vmatmul.msk.bf16.gmra.mxu1 %vm404_vm1, %v3643_v61 }
 0x18a   : > { %2926 = vmatmul.msk.bf16.gmra.mxu3 %vm404_vm1, %v3717_v31 }
 0x18c   : > { %v1418_v25 = vpop.f32.mrf.mxu2 }
 0x18d   : > { %v1436_v37 = vadd.f32 %v1418_v25, %v1330_v56  ;;  %v1456_v29 = vpop.f32.mrf.mxu3  ;;  %v1282_v48 = vpop.f32.mrf.mxu0  ;;  %v3051_v25 = vld [vmem:[%s3473_s27 + $0x4c] sm:$0xff] }
 0x18e   : > { %v1317_v38 = vpop.f32.mrf.mxu1  ;;  %v1297_v60 = vadd.f32 %v1282_v48, %v3915_v53 }
 0x18f   : > { %v3966_v0 = vadd.f32 %v1453_v4, %v1436_v37 }
 0x190   : > { %v1332_v24 = vadd.f32 %v1317_v38, %v1297_v60  ;;  %v1953_v38 = vshll.u32 %v3051_v25, 16 }
 0x191   : > { %2922 = vmatmul.msk.bf16.gmra.mxu2 %vm404_vm1, %v3632_v59 }
 0x194   : > { %v1421_v62 = vpop.f32.mrf.mxu2 }
 0x195   : > { %v1437_v57 = vadd.f32 %v1421_v62, %v1331_v34  ;;  %v1458_v2 = vpop.f32.mrf.mxu3  ;;  %v1285_v61 = vpop.f32.mrf.mxu0  ;;  %v3163_v62 = vld [vmem:[%s3473_s27 + $0x4c] sm:$0xff]  }
 0x196   : > { %v1320_v51 = vpop.f32.mrf.mxu1  ;;  %v1298_v50 = vadd.f32 %v1285_v61, %v3925_v35 }
 0x197   : > { %v3971_v10 = vadd.f32 %v1456_v29, %v1437_v57  ;;  %v1951_v57 = vshrl.u32 %v3051_v25, 16 }
 0x198   : > { %v1333_v55 = vadd.f32 %v1320_v51, %v1298_v50  ;;  %2915 = vmatmul.msk.bf16.gmra.mxu0 %vm404_vm1, %v3651_v7 }
 0x199   : > { %2919 = vmatmul.msk.bf16.gmra.mxu1 %vm404_vm1, %v3615_v42 }
 0x19a   : > { %2927 = vmatmul.msk.bf16.gmra.mxu3 %vm404_vm1, %v3739_v13 }
 0x19c   : > { %v1423_v59 = vpop.f32.mrf.mxu2 }
 0x19d   : > { %v1438_v53 = vadd.f32 %v1423_v59, %v1332_v24  ;;  %v1461_v46 = vpop.f32.mrf.mxu3  ;;  %v1287_v14 = vpop.f32.mrf.mxu0 }
 0x19e   : > { %v1322_v52 = vpop.f32.mrf.mxu1  ;;  %v1299_v1 = vadd.f32 %v1287_v14, %v1264_v30 }
 0x19f   : > { %v3980_v58 = vadd.f32 %v1458_v2, %v1438_v53  ;;  %v1955_v2 = vrot.slane %v1953_v38, 1  ;;  %v4028_v38 = vld [vmem:[%s3473_s27 + $0x78] sm:$0xff]  }
 0x1a0   : > { %v1334_v35 = vadd.f32 %v1322_v52, %v1299_v1 }
 0x1a1   : > { %2923 = vmatmul.msk.bf16.gmra.mxu2 %vm404_vm1, %v3654_v8  ;;  %v1956_v14 = vor.u32 %v1955_v2, %v1951_v57 }
 0x1a4   : > { %v1426_v56 = vpop.f32.mrf.mxu2 }
 0x1a5   : > { %v1439_v40 = vadd.f32 %v1426_v56, %v1333_v55  ;;  %v1463_v63 = vpop.f32.mrf.mxu3  ;;  %v1290_v42 = vpop.f32.mrf.mxu0  ;;  %v4001_v55 = vld [vmem:[%s3473_s27 + $0x70] sm:$0xff]  }
 0x1a6   : > { %v1325_v4 = vpop.f32.mrf.mxu1  ;;  %v1300_v5 = vadd.f32 %v1290_v42, %v3941_v16  ;;  %v3052_v16 = vld [vmem:[%s3473_s27 + $0x54] sm:$0xff]  ;;  %v3053_v42 = vld [vmem:[%s3473_s27 + $0x5c] sm:$0xff] }
 0x1a7   : > { %v3984_v23 = vadd.f32 %v1461_v46, %v1439_v40  ;;  %v1958_v61 = vshll.u32 %v3052_v16, 16  ;;  %v1966_v25 = vshll.u32 %v3053_v42, 16 }
 0x1a8   : > { %v1335_v27 = vadd.f32 %v1325_v4, %v1300_v5  ;;  %2916 = vmatmul.msk.bf16.gmra.mxu0 %vm404_vm1, %v3668_v17  ;;  %v1962_v5 = vshrl.u32 %v3052_v16, 16 }
 0x1a9   : > { %2920 = vmatmul.msk.bf16.gmra.mxu1 %vm404_vm1, %v3686_v39  ;;  %v1960_v52 = vrot.slane %v1958_v61, 1 }
 0x1aa   : > { %2928 = vmatmul.msk.bf16.gmra.mxu3 %vm404_vm1, %v3756_v6 }
 0x1ab   : > { %v1964_v16 = vor.u32 %v1962_v5, %v1960_v52 }
 0x1ac   : > { %v1428_v8 = vpop.f32.mrf.mxu2 }
 0x1ad   : > { %v1440_v30 = vadd.f32 %v1428_v8, %v1334_v35  ;;  %v1466_v34 = vpop.f32.mrf.mxu3  ;;  %v1292_v37 = vpop.f32.mrf.mxu0  ;;  %v4015_v35 = vsel %vm538_vm2, %v1956_v14, %v1960_v52  ;;  %v2961_v14 = vld [vmem:[%s3473_s27 + $0x64] sm:$0xf]  ;;  %v3054_v52 = vld [vmem:[%s3473_s27 + $0x64] sm:$0x10] }
 0x1ae   : > { %v1327_v29 = vpop.f32.mrf.mxu1 }
 0x1af   : > { %v3994_v48 = vadd.f32 %v1463_v63, %v1440_v30 }
 0x1b1   : > { %2924 = vmatmul.msk.bf16.gmra.mxu2 %vm404_vm1, %v3673_v19 }
 0x1b4   : > { %v1431_v60 = vpop.f32.mrf.mxu2 }
 0x1b5   : > { %v1441_v24 = vadd.f32 %v1431_v60, %v1335_v27  ;;  %v1468_v39 = vpop.f32.mrf.mxu3  ;;  %v1486_v51 = vpop.f32.mrf.mxu0 }
 0x1b6   : > { %v1592_v50 = vpop.f32.mrf.mxu1  ;;  %v1505_v53 = vadd.f32 %v1486_v51, %v3957_v47  ;;  %v1968_v39 = vrot.slane %v1966_v25, 1 }
 0x1b7   : > { %v4003_v59 = vadd.f32 %v1466_v34, %v1441_v24  ;;  %v3164_v34 = vld [vmem:[%s3473_s27 + $0x54] sm:$0xff]  }
 0x1b8   : > { %v1611_v46 = vadd.f32 %v1592_v50, %v1505_v53  ;;  %2930 = vmatmul.msk.bf16.vlgmr.msra.gmra.mxu0 %vm404_vm1, %v3163_v62  ;;  %v4040_v50 = vsel %vm538_vm2, %v1964_v16, %v1968_v39 }
 0x1b9   : > { %2935 = vmatmul.msk.bf16.vlgmr.msra.gmra.mxu1 %vm404_vm1, %v4001_v55  ;;  %2196 = vmatpush.bf16.msra.mxu0 %v3508_v43 }
 0x1ba   : > { %2967 = vmatmul.msk.bf16.vlgmr.msra.gmra.mxu3 %vm404_vm1, %v3596_v36  ;;  %2231 = vmatpush.bf16.msra.mxu1 %v3484_v33  ;;  %v2482_v36 = vmul.f32 %v3847_v9, %v1611_v46 }
 0x1bb   : > { %2372 = vmatpush.bf16.msra.mxu3 %v3574_v12 }
 0x1bc   : > { %v1433_v1 = vpop.f32.mrf.mxu2  ;;  %v2502_v27 = vmul.f32 %v2482_v36, %v1611_v46 }
 0x1bd   : > { %v1655_v47 = vpop.f32.mrf.mxu3  ;;  %v1488_v56 = vpop.f32.mrf.mxu0 }
 0x1be   : > { %v1594_v40 = vpop.f32.mrf.mxu1  ;;  %v1506_v63 = vadd.f32 %v1488_v56, %v3966_v0 }
 0x1c0   : > { %v1612_v43 = vadd.f32 %v1594_v40, %v1506_v63  ;;  %v4048_v63 = vor.u32 %v3054_v52, %v2961_v14  ;;  %v2929_v52 = vld [vmem:[%s3473_s27 + $0x64] sm:$0xf] }
 0x1c1   : > { %2963 = vmatmul.msk.bf16.vlgmr.msra.gmra.mxu2 %vm404_vm1, %v4015_v35 }
 0x1c2   : > { %2266 = vmatpush.bf16.msra.mxu2 %v3500_v41  ;;  %v2483_v33 = vmul.f32 %v3865_v21, %v1612_v43 }
 0x1c4   : > { %v1627_v12 = vpop.f32.mrf.mxu2  ;;  %v2489_v8 = vadd.f32 %v2483_v33, %v2482_v36  ;;  %v2503_v30 = vmul.f32 %v2483_v33, %v1612_v43 }
 0x1c5   : > { %v4024_v4 = vadd.f32 %v1655_v47, %v1627_v12  ;;  %v1657_v0 = vpop.f32.mrf.mxu3  ;;  %v1491_v37 = vpop.f32.mrf.mxu0  ;;  %v4301_v12 = vld [vmem:[#allocation6_spill] sm:$0xff] }
 0x1c6   : > { %v1597_v29 = vpop.f32.mrf.mxu1  ;;  %v2509_v60 = vadd.f32 %v2503_v30, %v2502_v27  ;;  %v1507_v24 = vadd.f32 %v1491_v37, %v3971_v10  ;;  %v4302_v5 = vunpack.c.l.b16 %v4301_v12 }
 0x1c8   : > { %v1613_v41 = vadd.f32 %v1597_v29, %v1507_v24  ;;  %2931 = vmatmul.msk.bf16.gmra.mxu0 %vm404_vm1, %v3164_v34  ;;  %v1974_v34 = vshll.u32 %v4048_v63, 16  ;;  %v4057_v29 = vld [vmem:[%s3473_s27 + $0x80] sm:$0xff]  }
 0x1c9   : > { %2936 = vmatmul.msk.bf16.gmra.mxu1 %vm404_vm1, %v4028_v38 }
 0x1ca   : > { %2968 = vmatmul.msk.bf16.gmra.mxu3 %vm404_vm1, %v3628_v54  ;;  %v2484_v62 = vmul.f32 %v3873_v26, %v1613_v41  ;;  %v3244_v54 = vld [vmem:[%s3473_s27 + $0x58] sm:$0xff]  }
 0x1cb   : > { %v3082_v56 = vunpack.c.h.b16 %v3244_v54  ;;  %v1816_v54 = vunpack.c.l.b16 %v2929_v52 }
 0x1cc   : > { %v1629_v57 = vpop.f32.mrf.mxu2  ;;  %v2490_v10 = vadd.f32 %v2489_v8, %v2484_v62  ;;  %v2504_v61 = vmul.f32 %v2484_v62, %v1613_v41  ;;  %v1976_v62 = vrot.slane %v1974_v34, 1  ;;  %v2475_v34 = vrot.slane %v3937_v49, 4 }
 0x1cd   : > { %v4037_v2 = vadd.f32 %v1657_v0, %v1629_v57  ;;  %v1660_v51 = vpop.f32.mrf.mxu3  ;;  %v1493_v53 = vpop.f32.mrf.mxu0  ;;  %v1819_v27 = vpack.c.b16 %v4302_v5, %v3082_v56  ;;  %v1970_v0 = vshrl.u32 %v3053_v42, 16 }
 0x1ce   : > { %v1599_v46 = vpop.f32.mrf.mxu1  ;;  %v2510_v1 = vadd.f32 %v2509_v60, %v2504_v61  ;;  %v1508_v47 = vadd.f32 %v1493_v53, %v3980_v58 }
 0x1cf   : > { %v1972_v16 = vor.u32 %v1970_v0, %v1968_v39 }
 0x1d0   : > { %v1614_v40 = vadd.f32 %v1599_v46, %v1508_v47 }
 0x1d1   : > { %2964 = vmatmul.msk.bf16.gmra.mxu2 %vm404_vm1, %v4040_v50  ;;  %v4069_v53 = vsel %vm538_vm2, %v1972_v16, %v1976_v62  ;;  %v2476_v16 = vadd.f32 %v2475_v34, %v3937_v49 }
 0x1d2   : > { %v2485_v36 = vmul.f32 %v3890_v28, %v1614_v40 }
 0x1d3   : > { %v2477_v52 = vrot.slane %v2476_v16, 2 }
 0x1d4   : > { %v1632_v43 = vpop.f32.mrf.mxu2  ;;  %v2491_v8 = vadd.f32 %v2490_v10, %v2485_v36  ;;  %v2505_v30 = vmul.f32 %v2485_v36, %v1614_v40 }
 0x1d5   : > { %v4051_v33 = vadd.f32 %v1660_v51, %v1632_v43  ;;  %v1662_v58 = vpop.f32.mrf.mxu3  ;;  %v1496_v25 = vpop.f32.mrf.mxu0  ;;  %v2455_v43 = vrot.slane %v3935_v45, 4 }
 0x1d6   : > { %v1602_v37 = vpop.f32.mrf.mxu1  ;;  %v2511_v60 = vadd.f32 %v2510_v1, %v2505_v30  ;;  %v1509_v24 = vadd.f32 %v1496_v25, %v3984_v23  ;;  %v2934_v1 = vld [vmem:[%s3473_s27 + $0x88] sm:$0xf]  ;;  %v1820_v30 = vpack.c.b16 %v1816_v54, %v1816_v54 }
 0x1d7   : > { %v1870_v56 = vunpack.c.l.b16 %v2934_v1 }
 0x1d8   : > { %v1615_v41 = vadd.f32 %v1602_v37, %v1509_v24  ;;  %2932 = vmatmul.msk.bf16.gmra.mxu0 %vm404_vm1, %v1819_v27  ;;  %v2456_v24 = vadd.f32 %v2455_v43, %v3935_v45 }
 0x1d9   : > { %2937 = vmatmul.msk.bf16.gmra.mxu1 %vm404_vm1, %v4057_v29 }
 0x1da   : > { %2969 = vmatmul.msk.bf16.gmra.mxu3 %vm404_vm1, %v3651_v7  ;;  %v2486_v42 = vmul.f32 %v3898_v3, %v1615_v41 }
 0x1dc   : > { %v1634_v57 = vpop.f32.mrf.mxu2  ;;  %v2492_v61 = vadd.f32 %v2491_v8, %v2486_v42  ;;  %v2506_v23 = vmul.f32 %v2486_v42, %v1615_v41 }
 0x1dd   : > { %v4066_v10 = vadd.f32 %v1662_v58, %v1634_v57  ;;  %v1665_v51 = vpop.f32.mrf.mxu3  ;;  %v1498_v46 = vpop.f32.mrf.mxu0  ;;  %v4080_v58 = vpack.c.b16 %v1870_v56, %v1870_v56 }
 0x1de   : > { %v1604_v14 = vpop.f32.mrf.mxu1  ;;  %v2512_v39 = vadd.f32 %v2511_v60, %v2506_v23  ;;  %v1510_v47 = vadd.f32 %v1498_v46, %v3994_v48  ;;  %v1978_v60 = vshrl.u32 %v4048_v63, 16  ;;  %v2457_v63 = vrot.slane %v2456_v24, 2 }
 0x1e0   : > { %v1616_v7 = vadd.f32 %v1604_v14, %v1510_v47 }
 0x1e1   : > { %2965 = vmatmul.msk.bf16.gmra.mxu2 %vm404_vm1, %v4069_v53 }
 0x1e2   : > { %v2487_v40 = vmul.f32 %v3913_v22, %v1616_v7 }
 0x1e4   : > { %v1637_v36 = vpop.f32.mrf.mxu2  ;;  %v2493_v5 = vadd.f32 %v2492_v61, %v2487_v40  ;;  %v2507_v27 = vmul.f32 %v2487_v40, %v1616_v7  ;;  %v2478_v7 = vadd.f32 %v2477_v52, %v2476_v16  ;;  %v3245_v16 = vld [vmem:[%s3473_s27 + $0x6c] sm:$0xff] }
 0x1e5   : > { %v4078_v12 = vadd.f32 %v1665_v51, %v1637_v36  ;;  %v1667_v8 = vpop.f32.mrf.mxu3  ;;  %v1501_v48 = vpop.f32.mrf.mxu0  ;;  %v3246_v52 = vld [vmem:[%s3473_s27 + $0x28] sm:$0xff]  }
 0x1e6   : > { %v1607_v0 = vpop.f32.mrf.mxu1  ;;  %v2513_v25 = vadd.f32 %v2512_v39, %v2507_v27  ;;  %v1511_v37 = vadd.f32 %v1501_v48, %v4003_v59  ;;  %v4095_v59 = vor.u32 %v1978_v60, %v1976_v62  ;;  %v2479_v48 = vrot.slane %v2478_v7, 1 }
 0x1e8   : > { %v1617_v41 = vadd.f32 %v1607_v0, %v1511_v37  ;;  %2933 = vmatmul.msk.bf16.gmra.mxu0 %vm404_vm1, %v1820_v30 }
 0x1e9   : > { %2938 = vmatmul.msk.bf16.gmra.mxu1 %vm404_vm1, %v4080_v58 }
 0x1ea   : > { %2970 = vmatmul.msk.bf16.gmra.mxu3 %vm404_vm1, %v3668_v17  ;;  %v2488_v42 = vmul.f32 %v3921_v18, %v1617_v41  ;;  %v2458_v17 = vadd.f32 %v2457_v63, %v2456_v24 }
 0x1ec   : > { %v1639_v57 = vpop.f32.mrf.mxu2  ;;  %v2494_v45 = vadd.f32 %v2493_v5, %v2488_v42  ;;  %v2508_v23 = vmul.f32 %v2488_v42, %v1617_v41  ;;  %v2459_v36 = vrot.slane %v2458_v17, 1  ;;  %v2480_v42 = vadd.f32 %v2479_v48, %v2478_v7 }
 0x1ed   : > { %v4093_v61 = vadd.f32 %v1667_v8, %v1639_v57  ;;  %v1670_v51 = vpop.f32.mrf.mxu3  ;;  %v1503_v46 = vpop.f32.mrf.mxu0 }
 0x1ee   : > { %v1609_v14 = vpop.f32.mrf.mxu1  ;;  %v2495_v1 = vrot.slane %v2494_v45, 4  ;;  %v2514_v39 = vadd.f32 %v2513_v25, %v2508_v23  ;;  %v2460_v37 = vadd.f32 %v2459_v36, %v2458_v17 }
 0x1f0   : > { %v2496_v49 = vadd.f32 %v2495_v1, %v2494_v45  ;;  %v2515_v47 = vrot.slane %v2514_v39, 4 }
 0x1f1   : > { %2966 = vmatmul.msk.bf16.gmra.mxu2 %vm404_vm1, %v4095_v59 }
 0x1f2   : > { %v2497_v54 = vrot.slane %v2496_v49, 2  ;;  %v2516_v56 = vadd.f32 %v2515_v47, %v2514_v39 }
 0x1f4   : > { %v1642_v62 = vpop.f32.mrf.mxu2  ;;  %v2498_v43 = vadd.f32 %v2497_v54, %v2496_v49  ;;  %v2517_v5 = vrot.slane %v2516_v56, 2 }
 0x1f5   : > { %v4099_v40 = vadd.f32 %v1670_v51, %v1642_v62  ;;  %v1672_v27 = vpop.f32.mrf.mxu3  ;;  %v1683_v8 = vpop.f32.mrf.mxu0  ;;  %v4303_v62 = vld [vmem:[#allocation7_spill] sm:$0xff] }
 0x1f6   : > { %v1718_v30 = vpop.f32.mrf.mxu1  ;;  %v2499_v0 = vrot.slane %v2498_v43, 1  ;;  %v2518_v34 = vadd.f32 %v2517_v5, %v2516_v56  ;;  %v1702_v25 = vadd.f32 %v1683_v8, %v4024_v4  ;;  %v3247_v56 = vld [vmem:[%s3473_s27 + $0x74] sm:$0xff] }
 0x1f8   : > { %v2500_v60 = vadd.f32 %v2499_v0, %v2498_v43  ;;  %v2519_v24 = vrot.slane %v2518_v34, 1  ;;  %v1737_v41 = vadd.f32 %v1718_v30, %v1702_v25  ;;  %2971 = vmatmul.msk.bf16.vlgmr.msrb.gmra.mxu0 %vm404_vm1, %v3245_v16  ;;  %v3248_v30 = vld [vmem:[%s3473_s27 + $0x30] sm:$0xff]   ;;  %v3249_v16 = vld [vmem:[%s3473_s27 + $0x7c] sm:$0xff] }
 0x1f9   : > { %2975 = vmatmul.msk.bf16.vlgmr.msrb.gmra.mxu1 %vm404_vm1, %v3787_v20 }
 0x1fa   : > { %2983 = vmatmul.msk.bf16.vlgmr.msrb.gmra.mxu3 %vm404_vm1, %v3697_v11  ;;  %v2520_v57 = vadd.f32 %v2519_v24, %v2518_v34  ;;  %v4108_v45 = vadd.f32 %v2500_v60, %v2460_v37 }
 0x1fc   : > { %v1644_v63 = vpop.f32.mrf.mxu2  ;;  %v4110_v23 = vadd.f32 %v2520_v57, %v2480_v42  ;;  %v4304_v42 = vld [vmem:[#allocation8_spill] sm:$0xff] }
 0x1fd   : > { %v1788_v4 = vpop.f32.mrf.mxu3  ;;  %v1685_v51 = vpop.f32.mrf.mxu0 }
 0x1fe   : > { %v1720_v46 = vpop.f32.mrf.mxu1  ;;  %v1703_v14 = vadd.f32 %v1685_v51, %v4037_v2 }
 0x200   : > { %v1738_v20 = vadd.f32 %v1720_v46, %v1703_v14  ;;  %v3250_v14 = vld [vmem:[%s3473_s27 + $0x38] sm:$0xff]  }
 0x201   : > { %2979 = vmatmul.msk.bf16.vlgmr.msrb.gmra.mxu2 %vm404_vm1, %v3246_v52 }
 0x204   : > { %v1753_v1 = vpop.f32.mrf.mxu2 }
 0x205   : > { %v1772_v39 = vadd.f32 %v1753_v1, %v1737_v41  ;;  %v1790_v11 = vpop.f32.mrf.mxu3  ;;  %v1688_v17 = vpop.f32.mrf.mxu0 }
 0x206   : > { %v1723_v49 = vpop.f32.mrf.mxu1  ;;  %v1704_v7 = vadd.f32 %v1688_v17, %v4051_v33 }
 0x207   : > { %v4115_v47 = vadd.f32 %v1788_v4, %v1772_v39 }
 0x208   : > { %v1739_v54 = vadd.f32 %v1723_v49, %v1704_v7  ;;  %2972 = vmatmul.msk.bf16.gmra.mxu0 %vm404_vm1, %v3247_v56  ;;  %v3055_v7 = vld [vmem:[%s3473_s27 + $0x70] sm:$0xff] }
 0x209   : > { %2976 = vmatmul.msk.bf16.gmra.mxu1 %vm404_vm1, %v4303_v62  ;;  %v3056_v62 = vld [vmem:[%s3473_s27 + $0x78] sm:$0xff] }
 0x20a   : > { %2984 = vmatmul.msk.bf16.gmra.mxu3 %vm404_vm1, %v3717_v31 }
 0x20c   : > { %v1755_v2 = vpop.f32.mrf.mxu2 }
 0x20d   : > { %v1773_v36 = vadd.f32 %v1755_v2, %v1738_v20  ;;  %v1793_v43 = vpop.f32.mrf.mxu3  ;;  %v1690_v5 = vpop.f32.mrf.mxu0  ;;  %v2325_v2 = vshll.u32 %v3055_v7, 16 }
 0x20e   : > { %v1725_v27 = vpop.f32.mrf.mxu1  ;;  %v1705_v33 = vadd.f32 %v1690_v5, %v4066_v10 }
 0x20f   : > { %v4124_v8 = vadd.f32 %v1790_v11, %v1773_v36 }
 0x210   : > { %v1740_v48 = vadd.f32 %v1725_v27, %v1705_v33 }
 0x211   : > { %2980 = vmatmul.msk.bf16.gmra.mxu2 %vm404_vm1, %v3248_v30  ;;  %v2327_v30 = vrot.slane %v2325_v2, 1 }
 0x214   : > { %v1758_v0 = vpop.f32.mrf.mxu2 }
 0x215   : > { %v1774_v34 = vadd.f32 %v1758_v0, %v1739_v54  ;;  %v1795_v25 = vpop.f32.mrf.mxu3  ;;  %v1693_v37 = vpop.f32.mrf.mxu0 }
 0x216   : > { %v1728_v31 = vpop.f32.mrf.mxu1  ;;  %v1706_v24 = vadd.f32 %v1693_v37, %v4078_v12 }
 0x217   : > { %v4129_v60 = vadd.f32 %v1793_v43, %v1774_v34 }
 0x218   : > { %v1741_v41 = vadd.f32 %v1728_v31, %v1706_v24  ;;  %2973 = vmatmul.msk.bf16.gmra.mxu0 %vm404_vm1, %v3249_v16 }
 0x219   : > { %2977 = vmatmul.msk.bf16.gmra.mxu1 %vm404_vm1, %v4304_v42 }
 0x21a   : > { %2985 = vmatmul.msk.bf16.gmra.mxu3 %vm404_vm1, %v3739_v13 }
 0x21c   : > { %v1760_v10 = vpop.f32.mrf.mxu2 }
 0x21d   : > { %v1775_v57 = vadd.f32 %v1760_v10, %v1740_v48  ;;  %v1798_v63 = vpop.f32.mrf.mxu3  ;;  %v1695_v4 = vpop.f32.mrf.mxu0  ;;  %v2330_v48 = vshll.u32 %v3056_v62, 16  ;;  %v4306_v10 = vld [vmem:[#allocation10_spill] sm:$0xff] }
 0x21e   : > { %v1730_v51 = vpop.f32.mrf.mxu1  ;;  %v1707_v12 = vadd.f32 %v1695_v4, %v4093_v61  ;;  %v4305_v61 = vld [vmem:[#allocation9_spill] sm:$0xff] }
 0x21f   : > { %v4138_v46 = vadd.f32 %v1795_v25, %v1775_v57  ;;  %v2332_v34 = vrot.slane %v2330_v48, 1  ;;  %v3057_v57 = vld [vmem:[%s3473_s27 + $0x80] sm:$0xff] }
 0x220   : > { %v1742_v52 = vadd.f32 %v1730_v51, %v1707_v12  ;;  %v2334_v12 = vshrl.u32 %v3056_v62, 16  ;;  %v4307_v62 = vld [vmem:[#allocation11_spill] sm:$0xff]  ;;  %v2342_v48 = vshrl.u32 %v3057_v57, 16 }
 0x221   : > { %2981 = vmatmul.msk.bf16.gmra.mxu2 %vm404_vm1, %v3250_v14  ;;  %v2338_v14 = vshll.u32 %v3057_v57, 16 }
 0x224   : > { %v1763_v20 = vpop.f32.mrf.mxu2 }
 0x225   : > { %v1776_v1 = vadd.f32 %v1763_v20, %v1741_v41  ;;  %v1800_v39 = vpop.f32.mrf.mxu3  ;;  %v1698_v11 = vpop.f32.mrf.mxu0 }
 0x226   : > { %v1733_v13 = vpop.f32.mrf.mxu1  ;;  %v1708_v49 = vadd.f32 %v1698_v11, %v4099_v40  ;;  %v2323_v40 = vshrl.u32 %v3055_v7, 16 }
 0x227   : > { %v4143_v17 = vadd.f32 %v1798_v63, %v1776_v1  ;;  %v2340_v1 = vrot.slane %v2338_v14, 1 }
 0x228   : > { %v1743_v54 = vadd.f32 %v1733_v13, %v1708_v49  ;;  %2974 = vmatmul.msk.bf16.gmra.mxu0 %vm404_vm1, %v3666_v15  ;;  %v2328_v0 = vor.u32 %v2327_v30, %v2323_v40 }
 0x229   : > { %2978 = vmatmul.msk.bf16.gmra.mxu1 %vm404_vm1, %v4305_v61  ;;  %v3021_v61 = vld [vmem:[%s3473_s27 + $0x88] sm:$0xf] }
 0x22a   : > { %2986 = vmatmul.msk.bf16.gmra.mxu3 %vm404_vm1, %v3756_v6  ;;  %v2333_v16 = vsel %vm538_vm2, %v2328_v0, %v2332_v34 }
 0x22c   : > { %v1765_v56 = vpop.f32.mrf.mxu2 }
 0x22d   : > { %v1777_v36 = vadd.f32 %v1765_v56, %v1742_v52  ;;  %v1803_v43 = vpop.f32.mrf.mxu3  ;;  %v1700_v5 = vpop.f32.mrf.mxu0 }
 0x22e   : > { %v1735_v27 = vpop.f32.mrf.mxu1 }
 0x22f   : > { %v4154_v33 = vadd.f32 %v1800_v39, %v1777_v36 }
 0x231   : > { %2982 = vmatmul.msk.bf16.gmra.mxu2 %vm404_vm1, %v3673_v19 }
 0x234   : > { %v1768_v15 = vpop.f32.mrf.mxu2 }
 0x235   : > { %v1778_v6 = vadd.f32 %v1768_v15, %v1743_v54  ;;  %v1805_v25 = vpop.f32.mrf.mxu3  ;;  %v1842_v37 = vpop.f32.mrf.mxu0 }
 0x236   : > { %v1896_v31 = vpop.f32.mrf.mxu1  ;;  %v1861_v41 = vadd.f32 %v1842_v37, %v4115_v47 }
 0x237   : > { %v4158_v24 = vadd.f32 %v1803_v43, %v1778_v6 }
 0x238   : > { %v1915_v42 = vadd.f32 %v1896_v31, %v1861_v41  ;;  %2987 = vmatmul.msk.bf16.vlgmr.msra.gmra.mxu0 %vm404_vm1, %v4306_v10  ;;  %v2344_v31 = vor.u32 %v2342_v48, %v2340_v1 }
 0x239   : > { %2991 = vmatmul.msk.bf16.vlgmr.msra.gmra.mxu1 %vm404_vm1, %v4001_v55  ;;  %v2336_v55 = vor.u32 %v2334_v12, %v2332_v34 }
 0x23a   : > { %3023 = vmatmul.msk.bf16.vlgmr.msra.gmra.mxu3 %vm404_vm1, %v2333_v16 }
 0x23b   : > { %v2341_v54 = vsel %vm538_vm2, %v2336_v55, %v2340_v1 }
 0x23c   : > { %v1770_v19 = vpop.f32.mrf.mxu2 }
 0x23d   : > { %v4168_v63 = vpop.f32.mrf.mxu3  ;;  %v1844_v4 = vpop.f32.mrf.mxu0 }
 0x23e   : > { %v1898_v51 = vpop.f32.mrf.mxu1  ;;  %v1862_v47 = vadd.f32 %v1844_v4, %v4124_v8  ;;  %v3058_v8 = vld [vmem:[%s3473_s27 + $0x88] sm:$0x10]  ;;  %s2690_s27 = sshll.u32 %s3443_s8, 1 }
 0x23f   : > { %v3022_v2 = vor.u32 %v3058_v8, %v3021_v61  ;;  %s352_s10 = scalar_lea.vmem [#allocation3], %s2690_s27 }
 0x240   : > { %v1916_v52 = vadd.f32 %v1898_v51, %v1862_v47  ;;  %s2617_s11 = sshll.u32 %s352_s10, 4  ;;  %s2618_s11 = int_to_ptr.vmem [resolvable:$true] %s2617_s11 }
 0x241   : > { %2995 = vmatmul.msk.bf16.vlgmr.msra.gmra.mxu2 %vm404_vm1, %v4015_v35  ;;  %v2346_v15 = vshll.u32 %v3022_v2, 16 }
 0x243   : > { %v2348_v41 = vrot.slane %v2346_v15, 1 }
 0x244   : > { %v2002_v20 = vpop.f32.mrf.mxu2 }
 0x245   : > { %v2021_v39 = vadd.f32 %v2002_v20, %v1915_v42  ;;  %v4173_v11 = vpop.f32.mrf.mxu3  ;;  %v1847_v13 = vpop.f32.mrf.mxu0  ;;  %v2349_v4 = vsel %vm538_vm2, %v2344_v31, %v2348_v41 }
 0x246   : > { %v1901_v49 = vpop.f32.mrf.mxu1  ;;  %v1863_v7 = vadd.f32 %v1847_v13, %v4129_v60 }
 0x247   : > { %v2522_v36 = vmul.f32 %v3847_v9, %v2021_v39 }
 0x248   : > { %v1917_v56 = vadd.f32 %v1901_v49, %v1863_v7  ;;  %2988 = vmatmul.msk.bf16.gmra.mxu0 %vm404_vm1, %v4307_v62  ;;  %v2350_v7 = vshrl.u32 %v3022_v2, 16 }
 0x249   : > { %2992 = vmatmul.msk.bf16.gmra.mxu1 %vm404_vm1, %v4028_v38  ;;  %v2542_v0 = vmul.f32 %v2522_v36, %v2021_v39 }
 0x24a   : > { %3024 = vmatmul.msk.bf16.gmra.mxu3 %vm404_vm1, %v2341_v54 }
 0x24c   : > { %v2004_v35 = vpop.f32.mrf.mxu2 }
 0x24d   : > { %v2022_v43 = vadd.f32 %v2004_v35, %v1916_v52  ;;  %v4185_v5 = vpop.f32.mrf.mxu3  ;;  %v1849_v27 = vpop.f32.mrf.mxu0 }
 0x24e   : > { %v1903_v40 = vpop.f32.mrf.mxu1  ;;  %v1864_v30 = vadd.f32 %v1849_v27, %v4138_v46 }
 0x24f   : > { %v2523_v60 = vmul.f32 %v3865_v21, %v2022_v43 }
 0x250   : > { %v1918_v6 = vadd.f32 %v1903_v40, %v1864_v30 }
 0x251   : > { %v2529_v34 = vadd.f32 %v2523_v60, %v2522_v36  ;;  %v2543_v38 = vmul.f32 %v2523_v60, %v2022_v43  ;;  %2996 = vmatmul.msk.bf16.gmra.mxu2 %vm404_vm1, %v4040_v50  ;;  %v2352_v36 = vor.u32 %v2350_v7, %v2348_v41 }
 0x253   : > { %v2549_v25 = vadd.f32 %v2543_v38, %v2542_v0 }
 0x254   : > { %v2007_v37 = vpop.f32.mrf.mxu2 }
 0x255   : > { %v2023_v16 = vadd.f32 %v2007_v37, %v1917_v56  ;;  %v4191_v42 = vpop.f32.mrf.mxu3  ;;  %v1852_v19 = vpop.f32.mrf.mxu0 }
 0x256   : > { %v1906_v46 = vpop.f32.mrf.mxu1  ;;  %v1865_v57 = vadd.f32 %v1852_v19, %v4143_v17 }
 0x257   : > { %v2524_v10 = vmul.f32 %v3873_v26, %v2023_v16 }
 0x258   : > { %v1919_v12 = vadd.f32 %v1906_v46, %v1865_v57  ;;  %2989 = vmatmul.msk.bf16.gmra.mxu0 %vm404_vm1, %v3901_v32 }
 0x259   : > { %v2530_v51 = vadd.f32 %v2529_v34, %v2524_v10  ;;  %v2544_v47 = vmul.f32 %v2524_v10, %v2023_v16  ;;  %2993 = vmatmul.msk.bf16.gmra.mxu1 %vm404_vm1, %v4057_v29 }
 0x25a   : > { %3025 = vmatmul.msk.bf16.gmra.mxu3 %vm404_vm1, %v2349_v4 }
 0x25b   : > { %v2550_v50 = vadd.f32 %v2549_v25, %v2544_v47 }
 0x25c   : > { %v2009_v14 = vpop.f32.mrf.mxu2 }
 0x25d   : > { %v2024_v52 = vadd.f32 %v2009_v14, %v1918_v6  ;;  %v4201_v20 = vpop.f32.mrf.mxu3  ;;  %v1854_v55 = vpop.f32.mrf.mxu0 }
 0x25e   : > { %v1908_v1 = vpop.f32.mrf.mxu1  ;;  %v1866_v39 = vadd.f32 %v1854_v55, %v4154_v33 }
 0x25f   : > { %v2525_v17 = vmul.f32 %v3890_v28, %v2024_v52 }
 0x260   : > { %v1920_v32 = vadd.f32 %v1908_v1, %v1866_v39 }
 0x261   : > { %v2531_v13 = vadd.f32 %v2530_v51, %v2525_v17  ;;  %v2545_v49 = vmul.f32 %v2525_v17, %v2024_v52  ;;  %2997 = vmatmul.msk.bf16.gmra.mxu2 %vm404_vm1, %v4069_v53 }
 0x263   : > { %v2551_v29 = vadd.f32 %v2550_v50, %v2545_v49 }
 0x264   : > { %v2012_v54 = vpop.f32.mrf.mxu2 }
 0x265   : > { %v2025_v61 = vadd.f32 %v2012_v54, %v1919_v12  ;;  %v4207_v8 = vpop.f32.mrf.mxu3  ;;  %v1857_v62 = vpop.f32.mrf.mxu0 }
 0x266   : > { %v1911_v35 = vpop.f32.mrf.mxu1  ;;  %v1867_v43 = vadd.f32 %v1857_v62, %v4158_v24 }
 0x267   : > { %v2526_v56 = vmul.f32 %v3898_v3, %v2025_v61 }
 0x268   : > { %v1921_v27 = vadd.f32 %v1911_v35, %v1867_v43  ;;  %2990 = vmatmul.msk.bf16.gmra.mxu0 %vm404_vm1, %v3923_v44 }
 0x269   : > { %v2532_v33 = vadd.f32 %v2531_v13, %v2526_v56  ;;  %v2546_v60 = vmul.f32 %v2526_v56, %v2025_v61  ;;  %2994 = vmatmul.msk.bf16.gmra.mxu1 %vm404_vm1, %v4080_v58 }
 0x26a   : > { %3026 = vmatmul.msk.bf16.gmra.mxu3 %vm404_vm1, %v2352_v36 }
 0x26b   : > { %v2552_v53 = vadd.f32 %v2551_v29, %v2546_v60 }
 0x26c   : > { %v2014_v2 = vpop.f32.mrf.mxu2 }
 0x26d   : > { %v2026_v40 = vadd.f32 %v2014_v2, %v1920_v32  ;;  %v4216_v30 = vpop.f32.mrf.mxu3  ;;  %v1859_v15 = vpop.f32.mrf.mxu0 }
 0x26e   : > { %v1913_v24 = vpop.f32.mrf.mxu1 }
 0x26f   : > { %v2527_v48 = vmul.f32 %v3913_v22, %v2026_v40 }
 0x271   : > { %v2533_v0 = vadd.f32 %v2532_v33, %v2527_v48  ;;  %v2547_v34 = vmul.f32 %v2527_v48, %v2026_v40  ;;  %2998 = vmatmul.msk.bf16.gmra.mxu2 %vm404_vm1, %v4095_v59 }
 0x273   : > { %v2553_v44 = vadd.f32 %v2552_v53, %v2547_v34 }
 0x274   : > { %v2017_v38 = vpop.f32.mrf.mxu2 }
 0x275   : > { %v2027_v6 = vadd.f32 %v2017_v38, %v1921_v27  ;;  %v2054_v58 = vpop.f32.mrf.mxu3  ;;  %v2065_v37 = vpop.f32.mrf.mxu0 }
 0x276   : > { %v2093_v31 = vpop.f32.mrf.mxu1  ;;  %v2066_v41 = vadd.f32 %v2065_v37, %v4168_v63 }
 0x277   : > { %v2528_v25 = vmul.f32 %v3921_v18, %v2027_v6 }
 0x278   : > { %v2112_v19 = vadd.f32 %v2093_v31, %v2066_v41 }
 0x279   : > { %v2534_v16 = vadd.f32 %v2533_v0, %v2528_v25  ;;  %v2548_v10 = vmul.f32 %v2528_v25, %v2027_v6 }
 0x27b   : > { %v2535_v46 = vrot.slane %v2534_v16, 4  ;;  %v2554_v57 = vadd.f32 %v2553_v44, %v2548_v10 }
 0x27c   : > { %v2019_v4 = vpop.f32.mrf.mxu2 }
 0x27d   : > { %v2536_v51 = vadd.f32 %v2535_v46, %v2534_v16  ;;  %v2555_v47 = vrot.slane %v2554_v57, 4  ;;  %v2163_v12 = vpop.f32.mrf.mxu3  ;;  %v2067_v14 = vpop.f32.mrf.mxu0 }
 0x27e   : > { %v2095_v52 = vpop.f32.mrf.mxu1  ;;  %v2068_v17 = vadd.f32 %v2067_v14, %v4173_v11 }
 0x27f   : > { %v2537_v59 = vrot.slane %v2536_v51, 2  ;;  %v2556_v50 = vadd.f32 %v2555_v47, %v2554_v57 }
 0x280   : > { %v2113_v39 = vadd.f32 %v2095_v52, %v2068_v17 }
 0x281   : > { %v2538_v55 = vadd.f32 %v2537_v59, %v2536_v51  ;;  %v2557_v1 = vrot.slane %v2556_v50, 2 }
 0x283   : > { %v2539_v13 = vrot.slane %v2538_v55, 1  ;;  %v2558_v63 = vadd.f32 %v2557_v1, %v2556_v50 }
 0x284   : > { %v2128_v49 = vpop.f32.mrf.mxu2 }
 0x285   : > { %v2540_v32 = vadd.f32 %v2539_v13, %v2538_v55  ;;  %v2559_v29 = vrot.slane %v2558_v63, 1  ;;  %v2147_v7 = vadd.f32 %v2128_v49, %v2112_v19  ;;  %v2165_v54 = vpop.f32.mrf.mxu3  ;;  %v2070_v56 = vpop.f32.mrf.mxu0 }
 0x286   : > { %v2098_v62 = vpop.f32.mrf.mxu1  ;;  %v2071_v43 = vadd.f32 %v2070_v56, %v4185_v5 }
 0x287   : > { %v2560_v61 = vadd.f32 %v2559_v29, %v2558_v63  ;;  %v2182_v35 = vadd.f32 %v2163_v12, %v2147_v7  ;;  %v4225_v36 = vadd.f32 %v2540_v32, %v4108_v45 }
 0x288   : > { %v2114_v33 = vadd.f32 %v2098_v62, %v2071_v43 }
 0x289   : > { %v4229_v11 = vadd.f32 %v2560_v61, %v4110_v23 }
 0x28c   : > { %v2130_v60 = vpop.f32.mrf.mxu2 }
 0x28d   : > { %v2148_v27 = vadd.f32 %v2130_v60, %v2113_v39  ;;  %v2168_v53 = vpop.f32.mrf.mxu3  ;;  %v2072_v2 = vpop.f32.mrf.mxu0 }
 0x28e   : > { %v2100_v40 = vpop.f32.mrf.mxu1  ;;  %v2073_v15 = vadd.f32 %v2072_v2, %v4191_v42 }
 0x28f   : > { %v2183_v48 = vadd.f32 %v2165_v54, %v2148_v27 }
 0x290   : > { %v2115_v24 = vadd.f32 %v2100_v40, %v2073_v15 }
 0x294   : > { %v2133_v0 = vpop.f32.mrf.mxu2 }
 0x295   : > { %v2149_v34 = vadd.f32 %v2133_v0, %v2114_v33  ;;  %v2170_v44 = vpop.f32.mrf.mxu3  ;;  %v2075_v45 = vpop.f32.mrf.mxu0 }
 0x296   : > { %v2103_v38 = vpop.f32.mrf.mxu1  ;;  %v2076_v5 = vadd.f32 %v2075_v45, %v4201_v20 }
 0x297   : > { %v2184_v6 = vadd.f32 %v2168_v53, %v2149_v34 }
 0x298   : > { %v2116_v23 = vadd.f32 %v2103_v38, %v2076_v5 }
 0x29c   : > { %v2135_v58 = vpop.f32.mrf.mxu2 }
 0x29d   : > { %v2150_v25 = vadd.f32 %v2135_v58, %v2115_v24  ;;  %v2173_v37 = vpop.f32.mrf.mxu3  ;;  %v2077_v31 = vpop.f32.mrf.mxu0 }
 0x29e   : > { %v2105_v41 = vpop.f32.mrf.mxu1  ;;  %v2078_v10 = vadd.f32 %v2077_v31, %v4207_v8 }
 0x29f   : > { %v2185_v16 = vadd.f32 %v2170_v44, %v2150_v25 }
 0x2a0   : > { %v2117_v19 = vadd.f32 %v2105_v41, %v2078_v10 }
 0x2a4   : > { %v2138_v42 = vpop.f32.mrf.mxu2 }
 0x2a5   : > { %v2151_v46 = vadd.f32 %v2138_v42, %v2116_v23  ;;  %v2175_v57 = vpop.f32.mrf.mxu3  ;;  %v2080_v4 = vpop.f32.mrf.mxu0 }
 0x2a6   : > { %v2108_v51 = vpop.f32.mrf.mxu1  ;;  %v2081_v12 = vadd.f32 %v2080_v4, %v4216_v30 }
 0x2a7   : > { %v2186_v47 = vadd.f32 %v2173_v37, %v2151_v46 }
 0x2a8   : > { %v2118_v59 = vadd.f32 %v2108_v51, %v2081_v12 }
 0x2ac   : > { %v2140_v20 = vpop.f32.mrf.mxu2 }
 0x2ad   : > { %v2152_v50 = vadd.f32 %v2140_v20, %v2117_v19  ;;  %v2178_v14 = vpop.f32.mrf.mxu3  ;;  %v2082_v52 = vpop.f32.mrf.mxu0 }
 0x2ae   : > { %v2110_v17 = vpop.f32.mrf.mxu1 }
 0x2af   : > { %v2187_v55 = vadd.f32 %v2175_v57, %v2152_v50 }
 0x2b4   : > { %v2143_v1 = vpop.f32.mrf.mxu2 }
 0x2b5   : > { %v2153_v39 = vadd.f32 %v2143_v1, %v2118_v59  ;;  %v2180_v13 = vpop.f32.mrf.mxu3  ;;  %v2198_v8 = vpop.f32.mrf.mxu0 }
 0x2b6   : > { %v2233_v63 = vpop.f32.mrf.mxu1  ;;  %v2217_v61 = vadd.f32 %v2198_v8, %v2182_v35 }
 0x2b7   : > { %v4235_v49 = vadd.f32 %v2178_v14, %v2153_v39 }
 0x2b8   : > { %v2252_v56 = vadd.f32 %v2233_v63, %v2217_v61 }
 0x2bc   : > { %v2145_v32 = vpop.f32.mrf.mxu2 }
 0x2bd   : > { %v2374_v29 = vpop.f32.mrf.mxu3  ;;  %v2200_v7 = vpop.f32.mrf.mxu0 }
 0x2be   : > { %v2235_v54 = vpop.f32.mrf.mxu1  ;;  %v2218_v43 = vadd.f32 %v2200_v7, %v2183_v48 }
 0x2c0   : > { %v2253_v53 = vadd.f32 %v2235_v54, %v2218_v43 }
 0x2c4   : > { %v2268_v30 = vpop.f32.mrf.mxu2 }
 0x2c5   : > { %v2376_v62 = vpop.f32.mrf.mxu3  ;;  %v2287_v33 = vadd.f32 %v2268_v30, %v2252_v56  ;;  %v2203_v60 = vpop.f32.mrf.mxu0 }
 0x2c6   : > { %v2238_v27 = vpop.f32.mrf.mxu1  ;;  %v2219_v34 = vadd.f32 %v2203_v60, %v2184_v6 }
 0x2c7   : > { %v2393_v2 = vadd.f32 %v2374_v29, %v2287_v33 }
 0x2c8   : > { %v2254_v23 = vadd.f32 %v2238_v27, %v2219_v34 }
 0x2c9   : > { %v2562_v0 = vmul.f32 %v3847_v9, %v2393_v2 }
 0x2cb   : > { %v2582_v5 = vmul.f32 %v2562_v0, %v2393_v2 }
 0x2cc   : > { %v2270_v40 = vpop.f32.mrf.mxu2 }
 0x2cd   : > { %v2288_v15 = vadd.f32 %v2270_v40, %v2253_v53  ;;  %v2379_v24 = vpop.f32.mrf.mxu3  ;;  %v2205_v45 = vpop.f32.mrf.mxu0 }
 0x2ce   : > { %v2240_v38 = vpop.f32.mrf.mxu1  ;;  %v2220_v10 = vadd.f32 %v2205_v45, %v2185_v16 }
 0x2cf   : > { %v2394_v44 = vadd.f32 %v2376_v62, %v2288_v15 }
 0x2d0   : > { %v2255_v6 = vadd.f32 %v2240_v38, %v2220_v10 }
 0x2d1   : > { %v2563_v35 = vmul.f32 %v3865_v21, %v2394_v44 }
 0x2d3   : > { %v2569_v58 = vadd.f32 %v2563_v35, %v2562_v0  ;;  %v2583_v48 = vmul.f32 %v2563_v35, %v2394_v44 }
 0x2d4   : > { %v2273_v25 = vpop.f32.mrf.mxu2 }
 0x2d5   : > { %v2589_v37 = vadd.f32 %v2583_v48, %v2582_v5  ;;  %v2289_v31 = vadd.f32 %v2273_v25, %v2254_v23  ;;  %v2381_v41 = vpop.f32.mrf.mxu3  ;;  %v2208_v42 = vpop.f32.mrf.mxu0 }
 0x2d6   : > { %v2243_v46 = vpop.f32.mrf.mxu1  ;;  %v2221_v20 = vadd.f32 %v2208_v42, %v2186_v47 }
 0x2d7   : > { %v2395_v19 = vadd.f32 %v2379_v24, %v2289_v31 }
 0x2d8   : > { %v2256_v1 = vadd.f32 %v2243_v46, %v2221_v20 }
 0x2d9   : > { %v2564_v9 = vmul.f32 %v3873_v26, %v2395_v19 }
 0x2db   : > { %v2570_v57 = vadd.f32 %v2569_v58, %v2564_v9  ;;  %v2584_v4 = vmul.f32 %v2564_v9, %v2395_v19 }
 0x2dc   : > { %v2275_v51 = vpop.f32.mrf.mxu2 }
 0x2dd   : > { %v2590_v12 = vadd.f32 %v2589_v37, %v2584_v4  ;;  %v2290_v21 = vadd.f32 %v2275_v51, %v2255_v6  ;;  %v2384_v59 = vpop.f32.mrf.mxu3  ;;  %v2210_v14 = vpop.f32.mrf.mxu0 }
 0x2de   : > { %v2245_v52 = vpop.f32.mrf.mxu1  ;;  %v2222_v32 = vadd.f32 %v2210_v14, %v2187_v55 }
 0x2df   : > { %v2396_v50 = vadd.f32 %v2381_v41, %v2290_v21 }
 0x2e0   : > { %v2257_v30 = vadd.f32 %v2245_v52, %v2222_v32 }
 0x2e1   : > { %v2565_v17 = vmul.f32 %v3890_v28, %v2396_v50 }
 0x2e3   : > { %v2571_v16 = vadd.f32 %v2570_v57, %v2565_v17  ;;  %v2585_v39 = vmul.f32 %v2565_v17, %v2396_v50 }
 0x2e4   : > { %v2278_v13 = vpop.f32.mrf.mxu2 }
 0x2e5   : > { %v2591_v8 = vadd.f32 %v2590_v12, %v2585_v39  ;;  %v2291_v63 = vadd.f32 %v2278_v13, %v2256_v1  ;;  %v2386_v26 = vpop.f32.mrf.mxu3  ;;  %v2213_v7 = vpop.f32.mrf.mxu0 }
 0x2e6   : > { %v2248_v54 = vpop.f32.mrf.mxu1  ;;  %v2223_v60 = vadd.f32 %v2213_v7, %v4235_v49 }
 0x2e7   : > { %v2397_v29 = vadd.f32 %v2384_v59, %v2291_v63 }
 0x2e8   : > { %v2258_v55 = vadd.f32 %v2248_v54, %v2223_v60 }
 0x2e9   : > { %v2566_v61 = vmul.f32 %v3898_v3, %v2397_v29 }
 0x2eb   : > { %v2572_v47 = vadd.f32 %v2571_v16, %v2566_v61  ;;  %v2586_v56 = vmul.f32 %v2566_v61, %v2397_v29 }
 0x2ec   : > { %v2280_v62 = vpop.f32.mrf.mxu2 }
 0x2ed   : > { %v2592_v43 = vadd.f32 %v2591_v8, %v2586_v56  ;;  %v2292_v33 = vadd.f32 %v2280_v62, %v2257_v30  ;;  %v2389_v28 = vpop.f32.mrf.mxu3  ;;  %v2215_v53 = vpop.f32.mrf.mxu0 }
 0x2ee   : > { %v2250_v2 = vpop.f32.mrf.mxu1 }
 0x2ef   : > { %v2398_v27 = vadd.f32 %v2386_v26, %v2292_v33 }
 0x2f1   : > { %v2567_v40 = vmul.f32 %v3913_v22, %v2398_v27 }
 0x2f3   : > { %v2573_v15 = vadd.f32 %v2572_v47, %v2567_v40  ;;  %v2587_v24 = vmul.f32 %v2567_v40, %v2398_v27 }
 0x2f4   : > { %v2283_v0 = vpop.f32.mrf.mxu2 }
 0x2f5   : > { %v2593_v3 = vadd.f32 %v2592_v43, %v2587_v24  ;;  %v2293_v34 = vadd.f32 %v2283_v0, %v2258_v55  ;;  %v2391_v44 = vpop.f32.mrf.mxu3 }
 0x2f7   : > { %v2399_v45 = vadd.f32 %v2389_v28, %v2293_v34 }
 0x2f9   : > { %v2568_v38 = vmul.f32 %v3921_v18, %v2399_v45 }
 0x2fb   : > { %v2574_v35 = vadd.f32 %v2573_v15, %v2568_v38  ;;  %v2588_v5 = vmul.f32 %v2568_v38, %v2399_v45 }
 0x2fc   : > { %v2285_v49 = vpop.f32.mrf.mxu2 }
 0x2fd   : > { %v2575_v23 = vrot.slane %v2574_v35, 4  ;;  %v2594_v58 = vadd.f32 %v2593_v3, %v2588_v5 }
 0x2ff   : > { %v2576_v48 = vadd.f32 %v2575_v23, %v2574_v35  ;;  %v2595_v25 = vrot.slane %v2594_v58, 4 }
 0x301   : > { %v2577_v22 = vrot.slane %v2576_v48, 2  ;;  %v2596_v37 = vadd.f32 %v2595_v25, %v2594_v58 }
 0x303   : > { %v2578_v31 = vadd.f32 %v2577_v22, %v2576_v48  ;;  %v2597_v41 = vrot.slane %v2596_v37, 2 }
 0x305   : > { %v2598_v10 = vadd.f32 %v2597_v41, %v2596_v37  ;;  %v2579_v19 = vrot.slane %v2578_v31, 1 }
 0x307   : > { %v2580_v18 = vadd.f32 %v2579_v19, %v2578_v31  ;;  %v2599_v42 = vrot.slane %v2598_v10, 1 }
 0x309   : > { %v2581_v46 = vadd.f32 %v2580_v18, %v4225_v36  ;;  %v2600_v9 = vadd.f32 %v2599_v42, %v2598_v10 }
 0x30b   : > { %v2601_v6 = vadd.f32 %v2600_v9, %v4229_v11  ;;  %2602 = vst [vmem:[%s352_s10] sm:$0x1] %v2581_v46 }
 0x30d   : > { %2603 = vst [vmem:[%s352_s10 + $0x1] sm:$0x1] %v2601_v6 }
 0x30e   : > { %3278 = shalt.err (!%p3275_p5)
}
 0x30f   : > { %3201 = dma.vmem_to_hbm [thread:$0]  (%p3374_p6), %s2618_s11, 32, %s2620_s17, %s2605_s16  }
 0x310 PF: > { %s2631_s8 = sand.u32 1, %s3301_s12   ;;  %p3204_p7 = pnand %p2687_p9, %p3378_p8 }
 0x311   : > { %s2632_s30 = scalar_lea.sflag [#allocation4], %s2631_s8 }
 0x312   : > { %p3205_p10 = pneg %p3204_p7 }
 0x314   : > { %3296 = dma.done.wait (%p3205_p10), %s2632_s30, 32  }
 0x315   : > { %3298 = vsyncadd (%p3205_p10), %s2632_s30, 4294967264  ;;  %p13_p11 = scmp.ge.s32.totalorder %s3359_s18, 4   ;;  %s4308_s12 = smov %s3305_s13 }
 0x316   : > { %s4309_s13 = smov %s3309_s14  ;;  %s4310_s14 = smov %s3372_s21 }
 0x317   : > { %s4311_s15 = smov %s3359_s18  ;;  %15 = sbr.rel (!%p13_p11) target bundleno = 3 (0x3), region = 124 }
 0x31c   :  { %2638 = vsyncpa [#allocation4], 1 }
 0x31d   :  { %2640 = vsyncpa [#allocation4 + $0x1], 1 }

</bundles_post_ra>
